<compile_context>
chip_gen: v7x
topology: tpu7x:2x2x1
jax: 0.10.0
libtpu: 0.0.40
codegen_flags: <defaults>
</compile_context>

<pallas_src>
import functools

import jax
import jax.numpy as jnp
from jax.experimental import pallas as pl
from jax.experimental.pallas import tpu as pltpu

EPS = 1e-5


def _round_up(n, m):
    return ((n + m - 1) // m) * m


def _silu(x):
    # Single-transcendental SiLU: x*sigmoid(x) == 0.5*x*(1 + tanh(0.5*x)).
    return 0.5 * x * (1.0 + jnp.tanh(0.5 * x))


def _group_norm(h, gamma, beta, num_groups, out_dtype):
    """GroupNorm over the channel axis of an f32 (B, C) tile.

    One-pass stats (var = E[x^2] - E[x]^2, f32, biased like torch); per-group stats
    are mapped back to per-channel with a (1, C) iota mask broadcast inside
    jnp.where (operands are (B, 1) per-row scalars, so nothing (B, C)-sized is
    materialized besides the final folded-affine FMA itself).
    """
    B, C = h.shape
    gs = C // num_groups
    mus, invs = [], []
    for g in range(num_groups):                  # static unroll (num_groups <= 2)
        seg = h[:, g * gs:(g + 1) * gs]
        mu = jnp.mean(seg, axis=1, keepdims=True)
        ex2 = jnp.mean(seg * seg, axis=1, keepdims=True)
        var = jnp.maximum(ex2 - mu * mu, 0.0)    # guard tiny negative from rounding
        mus.append(mu)
        invs.append(jax.lax.rsqrt(var + EPS))
    if num_groups == 1:
        mu_f, inv_f = mus[0], invs[0]
    else:
        cidx = jax.lax.broadcasted_iota(jnp.int32, (1, C), 1)   # (1, C), not (B, C)
        mu_f, inv_f = mus[-1], invs[-1]
        for g in range(num_groups - 2, -1, -1):
            mask = cidx < (g + 1) * gs
            mu_f = jnp.where(mask, mus[g], mu_f)
            inv_f = jnp.where(mask, invs[g], inv_f)
    scale = gamma * inv_f                        # (B, C)
    # Folded affine; cast to the matmul dtype here so no separate cast pass follows.
    return (h * scale + (beta - mu_f * scale)).astype(out_dtype)


def meta_regressor_kernel(x_ref,
                          w1_ref, b1_ref, g1_ref, be1_ref,
                          w2_ref, b2_ref, g2_ref, be2_ref,
                          w3_ref, b3_ref,
                          wo_ref, bo_ref,
                          pred_ref, emb_ref):
    wdt = w2_ref.dtype
    x = x_ref[...]                               # already bf16 (cast in wrapper)

    # Linear(D,1024) + SiLU + GroupNorm(2,1024)   [Dropout(0.15) = identity in eval]
    h1 = jnp.dot(x, w1_ref[...], preferred_element_type=jnp.float32) + b1_ref[...]
    h1 = _group_norm(_silu(h1), g1_ref[...], be1_ref[...], num_groups=2, out_dtype=wdt)

    # Linear(1024,512) + SiLU + GroupNorm(1,512)  [Dropout(0.15) = identity in eval]
    h2 = jnp.dot(h1, w2_ref[...], preferred_element_type=jnp.float32) + b2_ref[...]
    h2 = _group_norm(_silu(h2), g2_ref[...], be2_ref[...], num_groups=1, out_dtype=wdt)

    # Linear(512,256) -> binding_embedding
    emb = jnp.dot(h2, w3_ref[...], preferred_element_type=jnp.float32) + b3_ref[...]
    emb_ref[...] = emb.astype(emb_ref.dtype)

    # out(SiLU(emb)) -> predicted_BA.  N=1 matmul replaced by a VPU multiply + lane
    # reduction; result broadcast into a lane-dense 128-wide slab (no masked vst).
    pred = jnp.sum(_silu(emb) * wo_ref[...], axis=-1, keepdims=True) + bo_ref[...]
    pred_ref[...] = jnp.broadcast_to(pred, pred_ref.shape).astype(pred_ref.dtype)


@functools.partial(jax.jit, static_argnames=("tm",))
def meta_regressor(x, params, *, tm=1024):
    """Returns (predicted_BA (B,1) f32, binding_embedding (B,256) f32)."""
    B, D = x.shape
    (w1, b1, g1, be1, w2, b2, g2, be2, w3, b3, wo, bo) = params

    x = x.astype(w1.dtype)                       # stream the input at bf16

    # Tile: 1024 amortizes the ~0.35us/step overhead (v5e/v6e) and stays inside
    # v7x's 64 MiB/TC VMEM; batches > 1024 naturally get >=2 "parallel" grid steps
    # so both v7x TensorCores are used.
    tm = min(tm, 1024, _round_up(B, 8))
    Bp = _round_up(B, tm)
    if Bp != B:
        # Zero-padded rows hit GroupNorm with var=0 -> rsqrt(eps): finite garbage
        # that is sliced off below.  Intentional; do not "fix" with a mask.
        x = jnp.pad(x, ((0, Bp - B), (0, 0)))
    grid = (Bp // tm,)

    def batch_spec(feat):
        return pl.BlockSpec((tm, feat), lambda i: (i, 0))

    def const_spec(arr):
        # Whole array as one block, same block every step -> weights DMA once and
        # stay VMEM-resident while batch tiles stream through the pipeline.
        return pl.BlockSpec(arr.shape, lambda i: (0, 0))

    weights = (w1, b1, g1, be1, w2, b2, g2, be2, w3, b3, wo, bo)

    pred_pad, emb = pl.pallas_call(
        meta_regressor_kernel,
        out_shape=(jax.ShapeDtypeStruct((Bp, 128), jnp.bfloat16),   # lane-dense pred slab
                   jax.ShapeDtypeStruct((Bp, 256), jnp.float32)),
        grid=grid,
        in_specs=[batch_spec(D)] + [const_spec(a) for a in weights],
        out_specs=(batch_spec(128), batch_spec(256)),
        compiler_params=pltpu.CompilerParams(
            dimension_semantics=("parallel",),
            vmem_limit_bytes=48 * 1024 * 1024),
    )(x, *weights)

    return pred_pad[:B, :1].astype(jnp.float32), emb[:B]


def init_params(key, input_dim):
    ks = jax.random.split(key, 8)

    def lin(k, din, dout, wdtype=jnp.float32):
        kw, kb = jax.random.split(k)
        bound = 1.0 / jnp.sqrt(din)
        w = jax.random.uniform(kw, (din, dout), jnp.float32, -bound, bound).astype(wdtype)
        b = jax.random.uniform(kb, (1, dout), jnp.float32, -bound, bound)
        return w, b

    # Matmul weights in bf16 (f32 accumulation in-kernel); tiny 'out' weight kept f32
    # because it runs on the VPU reduction path.
    w1, b1 = lin(ks[0], input_dim, 1024, jnp.bfloat16)
    w2, b2 = lin(ks[1], 1024, 512, jnp.bfloat16)
    w3, b3 = lin(ks[2], 512, 256, jnp.bfloat16)
    wo, bo = lin(ks[3], 256, 1, jnp.float32)
    wo = wo.T  # stored as (1, 256) row for the VPU multiply + lane reduction

    # GroupNorm affine params (torch default: gamma=1, beta=0); perturbed so the
    # affine path is actually exercised.
    g1 = 1.0 + 0.01 * jax.random.normal(ks[4], (1, 1024), jnp.float32)
    be1 = 0.01 * jax.random.normal(ks[5], (1, 1024), jnp.float32)
    g2 = 1.0 + 0.01 * jax.random.normal(ks[6], (1, 512), jnp.float32)
    be2 = 0.01 * jax.random.normal(ks[7], (1, 512), jnp.float32)
    return (w1, b1, g1, be1, w2, b2, g2, be2, w3, b3, wo, bo)


def meta_regressor_ref(x, params):
    """Pure-JAX reference using the same (bf16-stored) weights."""
    (w1, b1, g1, be1, w2, b2, g2, be2, w3, b3, wo, bo) = params

    def gn(h, gamma, beta, groups):
        B, C = h.shape
        hg = h.reshape(B, groups, C // groups)
        mu = hg.mean(axis=2, keepdims=True)
        var = ((hg - mu) ** 2).mean(axis=2, keepdims=True)
        hn = ((hg - mu) * jax.lax.rsqrt(var + EPS)).reshape(B, C)
        return hn * gamma + beta

    def silu(v):
        return v * jax.nn.sigmoid(v)

    h1 = gn(silu(jnp.dot(x.astype(w1.dtype), w1,
                         preferred_element_type=jnp.float32) + b1), g1, be1, 2)
    h2 = gn(silu(jnp.dot(h1.astype(w2.dtype), w2,
                         preferred_element_type=jnp.float32) + b2), g2, be2, 1)
    emb = jnp.dot(h2.astype(w3.dtype), w3, preferred_element_type=jnp.float32) + b3
    pred = jnp.dot(silu(emb), wo.T, preferred_element_type=jnp.float32) + bo
    return pred, emb


if __name__ == "__main__":
    B, INPUT_DIM = 8, 32
    key = jax.random.PRNGKey(0)
    kx, kp = jax.random.split(key)
    x = jax.random.normal(kx, (B, INPUT_DIM), jnp.float32)
    params = init_params(kp, INPUT_DIM)

    pred, emb = meta_regressor(x, params)
    jax.block_until_ready((pred, emb))
    assert pred.shape == (B, 1) and emb.shape == (B, 256)

    pred_ref, emb_ref = meta_regressor_ref(x, params)
    assert bool(jnp.allclose(emb, emb_ref, atol=2e-2, rtol=2e-2))
    assert bool(jnp.allclose(pred, pred_ref, atol=2e-2, rtol=2e-2))
    print("KERNEL_OK")
</pallas_src>

<mosaic_0001>
module attributes {stable_mosaic.version = 11 : i64} {
  func.func @meta_regressor_kernel(%arg0: i32, %arg1: memref<8x32xbf16, #tpu.memory_space<vmem>>, %arg2: memref<32x1024xbf16, #tpu.memory_space<vmem>>, %arg3: memref<1x1024xf32, #tpu.memory_space<vmem>>, %arg4: memref<1x1024xf32, #tpu.memory_space<vmem>>, %arg5: memref<1x1024xf32, #tpu.memory_space<vmem>>, %arg6: memref<1024x512xbf16, #tpu.memory_space<vmem>>, %arg7: memref<1x512xf32, #tpu.memory_space<vmem>>, %arg8: memref<1x512xf32, #tpu.memory_space<vmem>>, %arg9: memref<1x512xf32, #tpu.memory_space<vmem>>, %arg10: memref<512x256xbf16, #tpu.memory_space<vmem>>, %arg11: memref<1x256xf32, #tpu.memory_space<vmem>>, %arg12: memref<1x256xf32, #tpu.memory_space<vmem>>, %arg13: memref<1x1xf32, #tpu.memory_space<vmem>>, %arg14: memref<8x128xbf16, #tpu.memory_space<vmem>>, %arg15: memref<8x256xf32, #tpu.memory_space<vmem>>) attributes {dimension_semantics = [#tpu.dimension_semantics<parallel>], iteration_bounds = array<i64: 1>, scalar_prefetch = 0 : i64, scratch_operands = 0 : i64, tpu.core_type = #tpu.core_type<tc>, window_params = [{transform_indices = @transform_0, window_bounds = array<i64: 8, 32>}, {pipeline_mode = #tpu.pipeline_mode<synchronous>, transform_indices = @transform_1, window_bounds = array<i64: 32, 1024>}, {pipeline_mode = #tpu.pipeline_mode<synchronous>, transform_indices = @transform_2, window_bounds = array<i64: 1, 1024>}, {pipeline_mode = #tpu.pipeline_mode<synchronous>, transform_indices = @transform_3, window_bounds = array<i64: 1, 1024>}, {pipeline_mode = #tpu.pipeline_mode<synchronous>, transform_indices = @transform_4, window_bounds = array<i64: 1, 1024>}, {pipeline_mode = #tpu.pipeline_mode<synchronous>, transform_indices = @transform_5, window_bounds = array<i64: 1024, 512>}, {pipeline_mode = #tpu.pipeline_mode<synchronous>, transform_indices = @transform_6, window_bounds = array<i64: 1, 512>}, {pipeline_mode = #tpu.pipeline_mode<synchronous>, transform_indices = @transform_7, window_bounds = array<i64: 1, 512>}, {pipeline_mode = #tpu.pipeline_mode<synchronous>, transform_indices = @transform_8, window_bounds = array<i64: 1, 512>}, {pipeline_mode = #tpu.pipeline_mode<synchronous>, transform_indices = @transform_9, window_bounds = array<i64: 512, 256>}, {pipeline_mode = #tpu.pipeline_mode<synchronous>, transform_indices = @transform_10, window_bounds = array<i64: 1, 256>}, {pipeline_mode = #tpu.pipeline_mode<synchronous>, transform_indices = @transform_11, window_bounds = array<i64: 1, 256>}, {pipeline_mode = #tpu.pipeline_mode<synchronous>, transform_indices = @transform_12, window_bounds = array<i64: 1, 1>}, {transform_indices = @transform_13, window_bounds = array<i64: 8, 128>}, {transform_indices = @transform_14, window_bounds = array<i64: 8, 256>}]} {
    %c0 = arith.constant 0 : index
    %c0_0 = arith.constant 0 : index
    %0 = vector.load %arg1[%c0, %c0_0] : memref<8x32xbf16, #tpu.memory_space<vmem>>, vector<8x32xbf16>
    %c0_1 = arith.constant 0 : index
    %c0_2 = arith.constant 0 : index
    %1 = vector.load %arg2[%c0_1, %c0_2] : memref<32x1024xbf16, #tpu.memory_space<vmem>>, vector<32x1024xbf16>
    %cst = arith.constant dense<0.000000e+00> : vector<8x1024xf32>
    %2 = tpu.matmul %0, %1, %cst {dimension_numbers = #tpu.dot_dimension_numbers<[1], [0], [0], [1], [0, 0, 1, 1], [], []>} : vector<8x32xbf16>, vector<32x1024xbf16>, vector<8x1024xf32> -> vector<8x1024xf32>
    %c0_3 = arith.constant 0 : index
    %c0_4 = arith.constant 0 : index
    %3 = vector.load %arg3[%c0_3, %c0_4] : memref<1x1024xf32, #tpu.memory_space<vmem>>, vector<1x1024xf32>
    %4 = vector.broadcast %3 : vector<1x1024xf32> to vector<8x1024xf32>
    %5 = arith.addf %2, %4 : vector<8x1024xf32>
    %cst_5 = arith.constant 5.000000e-01 : f32
    %6 = vector.broadcast %cst_5 : f32 to vector<8x1024xf32>
    %7 = arith.mulf %6, %5 : vector<8x1024xf32>
    %cst_6 = arith.constant 5.000000e-01 : f32
    %8 = vector.broadcast %cst_6 : f32 to vector<8x1024xf32>
    %9 = arith.mulf %8, %5 : vector<8x1024xf32>
    %10 = math.tanh %9 : vector<8x1024xf32>
    %cst_7 = arith.constant 1.000000e+00 : f32
    %11 = vector.broadcast %cst_7 : f32 to vector<8x1024xf32>
    %12 = arith.addf %11, %10 : vector<8x1024xf32>
    %13 = arith.mulf %7, %12 : vector<8x1024xf32>
    %c0_8 = arith.constant 0 : index
    %c0_9 = arith.constant 0 : index
    %14 = vector.load %arg4[%c0_8, %c0_9] : memref<1x1024xf32, #tpu.memory_space<vmem>>, vector<1x1024xf32>
    %c0_10 = arith.constant 0 : index
    %c0_11 = arith.constant 0 : index
    %15 = vector.load %arg5[%c0_10, %c0_11] : memref<1x1024xf32, #tpu.memory_space<vmem>>, vector<1x1024xf32>
    %16 = vector.extract_strided_slice %13 {offsets = [0, 0], sizes = [8, 512], strides = [1, 1]} : vector<8x1024xf32> to vector<8x512xf32>
    %cst_12 = arith.constant dense<0.000000e+00> : vector<8xf32>
    %17 = vector.multi_reduction <add>, %16, %cst_12 [1] : vector<8x512xf32> to vector<8xf32>
    %18 = vector.shape_cast %17 : vector<8xf32> to vector<8x1xf32>
    %cst_13 = arith.constant 5.120000e+02 : f32
    %19 = vector.broadcast %cst_13 : f32 to vector<8x1xf32>
    %20 = arith.divf %18, %19 : vector<8x1xf32>
    %21 = arith.mulf %16, %16 : vector<8x512xf32>
    %cst_14 = arith.constant dense<0.000000e+00> : vector<8xf32>
    %22 = vector.multi_reduction <add>, %21, %cst_14 [1] : vector<8x512xf32> to vector<8xf32>
    %23 = vector.shape_cast %22 : vector<8xf32> to vector<8x1xf32>
    %cst_15 = arith.constant 5.120000e+02 : f32
    %24 = vector.broadcast %cst_15 : f32 to vector<8x1xf32>
    %25 = arith.divf %23, %24 : vector<8x1xf32>
    %26 = arith.mulf %20, %20 : vector<8x1xf32>
    %27 = arith.subf %25, %26 : vector<8x1xf32>
    %cst_16 = arith.constant 0.000000e+00 : f32
    %28 = vector.broadcast %cst_16 : f32 to vector<8x1xf32>
    %29 = arith.maximumf %27, %28 : vector<8x1xf32>
    %cst_17 = arith.constant 9.99999974E-6 : f32
    %30 = vector.broadcast %cst_17 : f32 to vector<8x1xf32>
    %31 = arith.addf %29, %30 : vector<8x1xf32>
    %32 = math.rsqrt %31 : vector<8x1xf32>
    %33 = vector.extract_strided_slice %13 {offsets = [0, 512], sizes = [8, 512], strides = [1, 1]} : vector<8x1024xf32> to vector<8x512xf32>
    %cst_18 = arith.constant dense<0.000000e+00> : vector<8xf32>
    %34 = vector.multi_reduction <add>, %33, %cst_18 [1] : vector<8x512xf32> to vector<8xf32>
    %35 = vector.shape_cast %34 : vector<8xf32> to vector<8x1xf32>
    %cst_19 = arith.constant 5.120000e+02 : f32
    %36 = vector.broadcast %cst_19 : f32 to vector<8x1xf32>
    %37 = arith.divf %35, %36 : vector<8x1xf32>
    %38 = arith.mulf %33, %33 : vector<8x512xf32>
    %cst_20 = arith.constant dense<0.000000e+00> : vector<8xf32>
    %39 = vector.multi_reduction <add>, %38, %cst_20 [1] : vector<8x512xf32> to vector<8xf32>
    %40 = vector.shape_cast %39 : vector<8xf32> to vector<8x1xf32>
    %cst_21 = arith.constant 5.120000e+02 : f32
    %41 = vector.broadcast %cst_21 : f32 to vector<8x1xf32>
    %42 = arith.divf %40, %41 : vector<8x1xf32>
    %43 = arith.mulf %37, %37 : vector<8x1xf32>
    %44 = arith.subf %42, %43 : vector<8x1xf32>
    %cst_22 = arith.constant 0.000000e+00 : f32
    %45 = vector.broadcast %cst_22 : f32 to vector<8x1xf32>
    %46 = arith.maximumf %44, %45 : vector<8x1xf32>
    %cst_23 = arith.constant 9.99999974E-6 : f32
    %47 = vector.broadcast %cst_23 : f32 to vector<8x1xf32>
    %48 = arith.addf %46, %47 : vector<8x1xf32>
    %49 = math.rsqrt %48 : vector<8x1xf32>
    %50 = tpu.iota {dimensions = array<i32: 1>} : vector<1x1024xi32>
    %c512_i32 = arith.constant 512 : i32
    %51 = vector.broadcast %c512_i32 : i32 to vector<1x1024xi32>
    %52 = arith.cmpi slt, %50, %51 : vector<1x1024xi32>
    %53 = vector.shape_cast %52 : vector<1x1024xi1> to vector<1x1024xi1>
    %54 = vector.broadcast %53 : vector<1x1024xi1> to vector<8x1024xi1>
    %55 = vector.shape_cast %20 : vector<8x1xf32> to vector<8x1xf32>
    %56 = vector.broadcast %55 : vector<8x1xf32> to vector<8x1024xf32>
    %57 = vector.shape_cast %37 : vector<8x1xf32> to vector<8x1xf32>
    %58 = vector.broadcast %57 : vector<8x1xf32> to vector<8x1024xf32>
    %59 = arith.select %54, %56, %58 : vector<8x1024xi1>, vector<8x1024xf32>
    %60 = vector.shape_cast %52 : vector<1x1024xi1> to vector<1x1024xi1>
    %61 = vector.broadcast %60 : vector<1x1024xi1> to vector<8x1024xi1>
    %62 = vector.shape_cast %32 : vector<8x1xf32> to vector<8x1xf32>
    %63 = vector.broadcast %62 : vector<8x1xf32> to vector<8x1024xf32>
    %64 = vector.shape_cast %49 : vector<8x1xf32> to vector<8x1xf32>
    %65 = vector.broadcast %64 : vector<8x1xf32> to vector<8x1024xf32>
    %66 = arith.select %61, %63, %65 : vector<8x1024xi1>, vector<8x1024xf32>
    %67 = vector.broadcast %14 : vector<1x1024xf32> to vector<8x1024xf32>
    %68 = arith.mulf %67, %66 : vector<8x1024xf32>
    %69 = arith.mulf %13, %68 : vector<8x1024xf32>
    %70 = arith.mulf %59, %68 : vector<8x1024xf32>
    %71 = vector.broadcast %15 : vector<1x1024xf32> to vector<8x1024xf32>
    %72 = arith.subf %71, %70 : vector<8x1024xf32>
    %73 = arith.addf %69, %72 : vector<8x1024xf32>
    %74 = arith.truncf %73 : vector<8x1024xf32> to vector<8x1024xbf16>
    %c0_24 = arith.constant 0 : index
    %c0_25 = arith.constant 0 : index
    %75 = vector.load %arg6[%c0_24, %c0_25] : memref<1024x512xbf16, #tpu.memory_space<vmem>>, vector<1024x512xbf16>
    %cst_26 = arith.constant dense<0.000000e+00> : vector<8x512xf32>
    %76 = tpu.matmul %74, %75, %cst_26 {dimension_numbers = #tpu.dot_dimension_numbers<[1], [0], [0], [1], [0, 0, 1, 1], [], []>} : vector<8x1024xbf16>, vector<1024x512xbf16>, vector<8x512xf32> -> vector<8x512xf32>
    %c0_27 = arith.constant 0 : index
    %c0_28 = arith.constant 0 : index
    %77 = vector.load %arg7[%c0_27, %c0_28] : memref<1x512xf32, #tpu.memory_space<vmem>>, vector<1x512xf32>
    %78 = vector.broadcast %77 : vector<1x512xf32> to vector<8x512xf32>
    %79 = arith.addf %76, %78 : vector<8x512xf32>
    %cst_29 = arith.constant 5.000000e-01 : f32
    %80 = vector.broadcast %cst_29 : f32 to vector<8x512xf32>
    %81 = arith.mulf %80, %79 : vector<8x512xf32>
    %cst_30 = arith.constant 5.000000e-01 : f32
    %82 = vector.broadcast %cst_30 : f32 to vector<8x512xf32>
    %83 = arith.mulf %82, %79 : vector<8x512xf32>
    %84 = math.tanh %83 : vector<8x512xf32>
    %cst_31 = arith.constant 1.000000e+00 : f32
    %85 = vector.broadcast %cst_31 : f32 to vector<8x512xf32>
    %86 = arith.addf %85, %84 : vector<8x512xf32>
    %87 = arith.mulf %81, %86 : vector<8x512xf32>
    %c0_32 = arith.constant 0 : index
    %c0_33 = arith.constant 0 : index
    %88 = vector.load %arg8[%c0_32, %c0_33] : memref<1x512xf32, #tpu.memory_space<vmem>>, vector<1x512xf32>
    %c0_34 = arith.constant 0 : index
    %c0_35 = arith.constant 0 : index
    %89 = vector.load %arg9[%c0_34, %c0_35] : memref<1x512xf32, #tpu.memory_space<vmem>>, vector<1x512xf32>
    %cst_36 = arith.constant dense<0.000000e+00> : vector<8xf32>
    %90 = vector.multi_reduction <add>, %87, %cst_36 [1] : vector<8x512xf32> to vector<8xf32>
    %91 = vector.shape_cast %90 : vector<8xf32> to vector<8x1xf32>
    %cst_37 = arith.constant 5.120000e+02 : f32
    %92 = vector.broadcast %cst_37 : f32 to vector<8x1xf32>
    %93 = arith.divf %91, %92 : vector<8x1xf32>
    %94 = arith.mulf %87, %87 : vector<8x512xf32>
    %cst_38 = arith.constant dense<0.000000e+00> : vector<8xf32>
    %95 = vector.multi_reduction <add>, %94, %cst_38 [1] : vector<8x512xf32> to vector<8xf32>
    %96 = vector.shape_cast %95 : vector<8xf32> to vector<8x1xf32>
    %cst_39 = arith.constant 5.120000e+02 : f32
    %97 = vector.broadcast %cst_39 : f32 to vector<8x1xf32>
    %98 = arith.divf %96, %97 : vector<8x1xf32>
    %99 = arith.mulf %93, %93 : vector<8x1xf32>
    %100 = arith.subf %98, %99 : vector<8x1xf32>
    %cst_40 = arith.constant 0.000000e+00 : f32
    %101 = vector.broadcast %cst_40 : f32 to vector<8x1xf32>
    %102 = arith.maximumf %100, %101 : vector<8x1xf32>
    %cst_41 = arith.constant 9.99999974E-6 : f32
    %103 = vector.broadcast %cst_41 : f32 to vector<8x1xf32>
    %104 = arith.addf %102, %103 : vector<8x1xf32>
    %105 = math.rsqrt %104 : vector<8x1xf32>
    %106 = vector.broadcast %88 : vector<1x512xf32> to vector<8x512xf32>
    %107 = vector.broadcast %105 : vector<8x1xf32> to vector<8x512xf32>
    %108 = arith.mulf %106, %107 : vector<8x512xf32>
    %109 = arith.mulf %87, %108 : vector<8x512xf32>
    %110 = vector.broadcast %93 : vector<8x1xf32> to vector<8x512xf32>
    %111 = arith.mulf %110, %108 : vector<8x512xf32>
    %112 = vector.broadcast %89 : vector<1x512xf32> to vector<8x512xf32>
    %113 = arith.subf %112, %111 : vector<8x512xf32>
    %114 = arith.addf %109, %113 : vector<8x512xf32>
    %115 = arith.truncf %114 : vector<8x512xf32> to vector<8x512xbf16>
    %c0_42 = arith.constant 0 : index
    %c0_43 = arith.constant 0 : index
    %116 = vector.load %arg10[%c0_42, %c0_43] : memref<512x256xbf16, #tpu.memory_space<vmem>>, vector<512x256xbf16>
    %cst_44 = arith.constant dense<0.000000e+00> : vector<8x256xf32>
    %117 = tpu.matmul %115, %116, %cst_44 {dimension_numbers = #tpu.dot_dimension_numbers<[1], [0], [0], [1], [0, 0, 1, 1], [], []>} : vector<8x512xbf16>, vector<512x256xbf16>, vector<8x256xf32> -> vector<8x256xf32>
    %c0_45 = arith.constant 0 : index
    %c0_46 = arith.constant 0 : index
    %118 = vector.load %arg11[%c0_45, %c0_46] : memref<1x256xf32, #tpu.memory_space<vmem>>, vector<1x256xf32>
    %119 = vector.broadcast %118 : vector<1x256xf32> to vector<8x256xf32>
    %120 = arith.addf %117, %119 : vector<8x256xf32>
    %c0_47 = arith.constant 0 : index
    %c0_48 = arith.constant 0 : index
    %121 = vector.load %arg15[%c0_47, %c0_48] : memref<8x256xf32, #tpu.memory_space<vmem>>, vector<8x256xf32>
    tpu.vector_store %arg15[%c0_47, %c0_48], %120 {strides = array<i32>} : memref<8x256xf32, #tpu.memory_space<vmem>>, vector<8x256xf32>,
    %cst_49 = arith.constant 5.000000e-01 : f32
    %122 = vector.broadcast %cst_49 : f32 to vector<8x256xf32>
    %123 = arith.mulf %122, %120 : vector<8x256xf32>
    %cst_50 = arith.constant 5.000000e-01 : f32
    %124 = vector.broadcast %cst_50 : f32 to vector<8x256xf32>
    %125 = arith.mulf %124, %120 : vector<8x256xf32>
    %126 = math.tanh %125 : vector<8x256xf32>
    %cst_51 = arith.constant 1.000000e+00 : f32
    %127 = vector.broadcast %cst_51 : f32 to vector<8x256xf32>
    %128 = arith.addf %127, %126 : vector<8x256xf32>
    %129 = arith.mulf %123, %128 : vector<8x256xf32>
    %c0_52 = arith.constant 0 : index
    %c0_53 = arith.constant 0 : index
    %130 = vector.load %arg12[%c0_52, %c0_53] : memref<1x256xf32, #tpu.memory_space<vmem>>, vector<1x256xf32>
    %131 = vector.broadcast %130 : vector<1x256xf32> to vector<8x256xf32>
    %132 = arith.mulf %129, %131 : vector<8x256xf32>
    %cst_54 = arith.constant dense<0.000000e+00> : vector<8xf32>
    %133 = vector.multi_reduction <add>, %132, %cst_54 [1] : vector<8x256xf32> to vector<8xf32>
    %134 = vector.shape_cast %133 : vector<8xf32> to vector<8x1xf32>
    %c0_55 = arith.constant 0 : index
    %c0_56 = arith.constant 0 : index
    %135 = vector.load %arg13[%c0_55, %c0_56] : memref<1x1xf32, #tpu.memory_space<vmem>>, vector<1x1xf32>
    %136 = vector.broadcast %135 : vector<1x1xf32> to vector<8x1xf32>
    %137 = arith.addf %134, %136 : vector<8x1xf32>
    %138 = vector.shape_cast %137 : vector<8x1xf32> to vector<8x1xf32>
    %139 = vector.broadcast %138 : vector<8x1xf32> to vector<8x128xf32>
    %140 = arith.truncf %139 : vector<8x128xf32> to vector<8x128xbf16>
    %c0_57 = arith.constant 0 : index
    %c0_58 = arith.constant 0 : index
    %141 = vector.load %arg14[%c0_57, %c0_58] : memref<8x128xbf16, #tpu.memory_space<vmem>>, vector<8x128xbf16>
    tpu.vector_store %arg14[%c0_57, %c0_58], %140 {strides = array<i32>} : memref<8x128xbf16, #tpu.memory_space<vmem>>, vector<8x128xbf16>,
    return
  }
  func.func @transform_0(%arg0: i32) -> (i32, i32) {
    %c0_i32 = arith.constant 0 : i32
    %c0_i32_0 = arith.constant 0 : i32
    return %arg0, %c0_i32 : i32, i32
  }
  func.func @transform_1(%arg0: i32) -> (i32, i32) {
    %c0_i32 = arith.constant 0 : i32
    %c0_i32_0 = arith.constant 0 : i32
    %c0_i32_1 = arith.constant 0 : i32
    return %c0_i32, %c0_i32_0 : i32, i32
  }
  func.func @transform_2(%arg0: i32) -> (i32, i32) {
    %c0_i32 = arith.constant 0 : i32
    %c0_i32_0 = arith.constant 0 : i32
    %c0_i32_1 = arith.constant 0 : i32
    return %c0_i32, %c0_i32_0 : i32, i32
  }
  func.func @transform_3(%arg0: i32) -> (i32, i32) {
    %c0_i32 = arith.constant 0 : i32
    %c0_i32_0 = arith.constant 0 : i32
    %c0_i32_1 = arith.constant 0 : i32
    return %c0_i32, %c0_i32_0 : i32, i32
  }
  func.func @transform_4(%arg0: i32) -> (i32, i32) {
    %c0_i32 = arith.constant 0 : i32
    %c0_i32_0 = arith.constant 0 : i32
    %c0_i32_1 = arith.constant 0 : i32
    return %c0_i32, %c0_i32_0 : i32, i32
  }
  func.func @transform_5(%arg0: i32) -> (i32, i32) {
    %c0_i32 = arith.constant 0 : i32
    %c0_i32_0 = arith.constant 0 : i32
    %c0_i32_1 = arith.constant 0 : i32
    return %c0_i32, %c0_i32_0 : i32, i32
  }
  func.func @transform_6(%arg0: i32) -> (i32, i32) {
    %c0_i32 = arith.constant 0 : i32
    %c0_i32_0 = arith.constant 0 : i32
    %c0_i32_1 = arith.constant 0 : i32
    return %c0_i32, %c0_i32_0 : i32, i32
  }
  func.func @transform_7(%arg0: i32) -> (i32, i32) {
    %c0_i32 = arith.constant 0 : i32
    %c0_i32_0 = arith.constant 0 : i32
    %c0_i32_1 = arith.constant 0 : i32
    return %c0_i32, %c0_i32_0 : i32, i32
  }
  func.func @transform_8(%arg0: i32) -> (i32, i32) {
    %c0_i32 = arith.constant 0 : i32
    %c0_i32_0 = arith.constant 0 : i32
    %c0_i32_1 = arith.constant 0 : i32
    return %c0_i32, %c0_i32_0 : i32, i32
  }
  func.func @transform_9(%arg0: i32) -> (i32, i32) {
    %c0_i32 = arith.constant 0 : i32
    %c0_i32_0 = arith.constant 0 : i32
    %c0_i32_1 = arith.constant 0 : i32
    return %c0_i32, %c0_i32_0 : i32, i32
  }
  func.func @transform_10(%arg0: i32) -> (i32, i32) {
    %c0_i32 = arith.constant 0 : i32
    %c0_i32_0 = arith.constant 0 : i32
    %c0_i32_1 = arith.constant 0 : i32
    return %c0_i32, %c0_i32_0 : i32, i32
  }
  func.func @transform_11(%arg0: i32) -> (i32, i32) {
    %c0_i32 = arith.constant 0 : i32
    %c0_i32_0 = arith.constant 0 : i32
    %c0_i32_1 = arith.constant 0 : i32
    return %c0_i32, %c0_i32_0 : i32, i32
  }
  func.func @transform_12(%arg0: i32) -> (i32, i32) {
    %c0_i32 = arith.constant 0 : i32
    %c0_i32_0 = arith.constant 0 : i32
    %c0_i32_1 = arith.constant 0 : i32
    return %c0_i32, %c0_i32_0 : i32, i32
  }
  func.func @transform_13(%arg0: i32) -> (i32, i32) {
    %c0_i32 = arith.constant 0 : i32
    %c0_i32_0 = arith.constant 0 : i32
    return %arg0, %c0_i32 : i32, i32
  }
  func.func @transform_14(%arg0: i32) -> (i32, i32) {
    %c0_i32 = arith.constant 0 : i32
    %c0_i32_0 = arith.constant 0 : i32
    return %arg0, %c0_i32 : i32, i32
  }
}

</mosaic_0001>

<bundles_post_ra>
// kernel: meta_regressor.1
= control target key start
LH: loop header
LB: loop body
LE: loop exit
PB: predicated region body
PF: predicated region fallthrough
CT: control target
= control target key end

     0   :  { %s4540_s0 = inlined_call_operand.vmem [shape: bf16[8,32], index: 0, kind: input, shape index: {}]   ;;  %s4541_s1 = inlined_call_operand.hbm [shape: bf16[32,1024], index: 1, kind: input, shape index: {}]   ;;  %s4542_s2 = inlined_call_operand.vmem [shape: f32[1,1024], index: 2, kind: input, shape index: {}]   ;;  %s4543_s3 = inlined_call_operand.vmem [shape: f32[1,1024], index: 3, kind: input, shape index: {}]   ;;  %s4544_s4 = inlined_call_operand.vmem [shape: f32[1,1024], index: 4, kind: input, shape index: {}]   ;;  %s4545_s5 = inlined_call_operand.hbm [shape: bf16[1024,512], index: 5, kind: input, shape index: {}]   ;;  %s4546_s6 = inlined_call_operand.vmem [shape: f32[1,512], index: 6, kind: input, shape index: {}]   ;;  %s4547_s7 = inlined_call_operand.vmem [shape: f32[1,512], index: 7, kind: input, shape index: {}]   ;;  %s4548_s8 = inlined_call_operand.vmem [shape: f32[1,512], index: 8, kind: input, shape index: {}]   ;;  %s4549_s9 = inlined_call_operand.hbm [shape: bf16[512,256], index: 9, kind: input, shape index: {}]   ;;  %s4550_s10 = inlined_call_operand.vmem [shape: f32[1,256], index: 10, kind: input, shape index: {}]   ;;  %s4551_s11 = inlined_call_operand.vmem [shape: f32[1,256], index: 11, kind: input, shape index: {}]   ;;  %s4552_s12 = inlined_call_operand.<no memory space> [shape: f32[1,1], index: 12, kind: input, shape index: {}]   ;;  %s4553_s13 = inlined_call_operand.vmem [shape: bf16[8,128], index: 13, kind: output, shape index: {0}]   ;;  %s4554_s14 = inlined_call_operand.hbm [shape: f32[8,256], index: 14, kind: output, shape index: {1}]  }
   0x1   :  { %v20_v0 = vstv %s4552_s12 }
   0x2   :  { %21 = vst [vmem:[#allocation2] sm:$0x1] %v20_v0 }
   0x3   :  { %22 = vsyncpa [#allocation4], 0 }
   0x4   :  { %23 = vsyncpa [#allocation7], 0 }
   0x5   :  { %24 = vsyncpa [#allocation5], 0  ;;  %s4179_s15 = smov [#allocation6]   ;;  %s4085_s19 = scalar_lea.hbm %s4545_s5, 32768 }
   0x6   :  { %s50_s16 = sshll.u32 %s4179_s15, 4  ;;  %p4086_p0 = scmp.ne.s32.totalorder %s4545_s5, %s4085_s19  ;;  %s51_s16 = int_to_ptr.vmem [resolvable:$true] %s50_s16 }
   0x7   :  { %p4089_p1 = scmp.lt.u32.totalorder %s4085_s19, %s4545_s5 }
   0x9   :  { %p4091_p2 = pnand %p4089_p1, %p4086_p0 }
   0xb   :  { %4094 = shalt.err (!%p4091_p2)
}
   0xc   :  { %s4095_s12 = scalar_lea.vmem %s51_s16, 32768  ;;  %p4100_p4 = scmp.lt.s32.totalorder %s51_s16, %s51_s16 }
   0xd   :  { %p4096_p3 = scmp.ne.s32.totalorder %s51_s16, %s4095_s12  ;;  %p4101_p5 = scmp.lt.s32.totalorder %s4095_s12, %s4095_s12 }
   0xf   :  { %p4102_p6 = por %p4101_p5, %p4100_p4 }
  0x11   :  { %p4103_p7 = pnand %p4102_p6, %p4096_p3 }
  0x13   :  { %4106 = shalt.err (!%p4103_p7)
}
  0x14   :  { %s4180_s24 = smov 256   ;;  %s4181_s25 = smov 16  }
  0x15   :  { %56 = dma.hbm_to_vmem [thread:$0]  %s4545_s5, 32768, %s51_s16, [#allocation7], %s4180_s24, %s4180_s24, %s4181_s25  }
  0x16   :  { %s4182_s28 = smov [#allocation3]   ;;  %s4107_s17 = scalar_lea.hbm %s4541_s1, 2048 }
  0x17   :  { %s32_s29 = sshll.u32 %s4182_s28, 4  ;;  %p4108_p8 = scmp.ne.s32.totalorder %s4541_s1, %s4107_s17  ;;  %s33_s29 = int_to_ptr.vmem [resolvable:$true] %s32_s29 }
  0x18   :  { %p4111_p9 = scmp.lt.u32.totalorder %s4107_s17, %s4541_s1 }
  0x1a   :  { %p4113_p10 = pnand %p4111_p9, %p4108_p8 }
  0x1c   :  { %4116 = shalt.err (!%p4113_p10)
}
  0x1d   :  { %s4117_s22 = scalar_lea.vmem %s33_s29, 2048  ;;  %p4122_p12 = scmp.lt.s32.totalorder %s33_s29, %s33_s29 }
  0x1e   :  { %p4118_p11 = scmp.ne.s32.totalorder %s33_s29, %s4117_s22  ;;  %p4123_p13 = scmp.lt.s32.totalorder %s4117_s22, %s4117_s22 }
  0x20   :  { %p4124_p0 = por %p4123_p13, %p4122_p12 }
  0x22   :  { %p4125_p1 = pnand %p4124_p0, %p4118_p11 }
  0x24   :  { %4128 = shalt.err (!%p4125_p1)
}
  0x25   :  { %s4183_s5 = smov 512   ;;  %s4184_s16 = smov 32  }
  0x26   :  { %38 = dma.hbm_to_vmem [thread:$0]  %s4541_s1, 2048, %s33_s29, [#allocation4], %s4183_s5, %s4183_s5, %s4184_s16  }
  0x27   :  { %s4185_s24 = smov [#allocation8]   ;;  %s4129_s28 = scalar_lea.hbm %s4549_s9, 8192 }
  0x28   :  { %s68_s25 = sshll.u32 %s4185_s24, 4  ;;  %p4130_p2 = scmp.ne.s32.totalorder %s4549_s9, %s4129_s28  ;;  %s69_s25 = int_to_ptr.vmem [resolvable:$true] %s68_s25 }
  0x29   :  { %p4133_p3 = scmp.lt.u32.totalorder %s4129_s28, %s4549_s9 }
  0x2b   :  { %p4135_p4 = pnand %p4133_p3, %p4130_p2 }
  0x2d   :  { %4138 = shalt.err (!%p4135_p4)
}
  0x2e   :  { %s4139_s19 = scalar_lea.vmem %s69_s25, 8192  ;;  %p4144_p6 = scmp.lt.s32.totalorder %s69_s25, %s69_s25 }
  0x2f   :  { %p4140_p5 = scmp.ne.s32.totalorder %s69_s25, %s4139_s19  ;;  %p4145_p7 = scmp.lt.s32.totalorder %s4139_s19, %s4139_s19 }
  0x31   :  { %p4146_p8 = por %p4145_p7, %p4144_p6 }
  0x33   :  { %p4147_p9 = pnand %p4146_p8, %p4140_p5 }
  0x35   :  { %4150 = shalt.err (!%p4147_p9)
}
  0x36   :  { %s4186_s1 = smov 128   ;;  %s4187_s29 = smov 8  }
  0x37   :  { %74 = dma.hbm_to_vmem [thread:$0]  %s4549_s9, 8192, %s69_s25, [#allocation7], %s4186_s1, %s4186_s1, %s4187_s29  }
  0x38   :  { %4173 = dma.done.wait [#allocation4], 2048  }
  0x39   :  { %4174 = vsyncadd [#allocation4], 4294965248 }
  0x3a   :  { %4175 = dma.done.wait [#allocation7], 40960  }
  0x3b   :  { %4176 = vsyncadd [#allocation7], 4294926336  ;;  %v4188_v1 = vmov 0   ;;  %v92_v2 = vld [vmem:[#allocation3] sm:$0xff]  ;;  %v93_v4 = vld [vmem:[#allocation3 + $0x8] sm:$0xff]  ;;  %vm230_vm0 = vcmask 261120  }
  0x3c   :  { %266 = vmatprep.mubr.bf16.mxu0 %v4188_v1  ;;  %307 = vmatprep.mubr.bf16.mxu1 %v4188_v1  ;;  %v96_v3 = vld [vmem:[#allocation3 + $0x20] sm:$0xff]  ;;  %v97_v6 = vld [vmem:[#allocation3 + $0x28] sm:$0xff]  ;;  %v94_v16 = vld [vmem:[#allocation3 + $0x10] sm:$0xff] }
  0x3d   :  { %3569 = vset.pattern.permute.xlu1 %v4188_v1  ;;  %3570 = vset.pattern.permute.xlu0 %v4188_v1  ;;  %v3186_v5 = vcombine.high %v92_v2, %v96_v3  ;;  %v3185_v7 = vcombine.low %v92_v2, %v96_v3  ;;  %v100_v8 = vld [vmem:[#allocation3 + $0x40] sm:$0xff]  ;;  %v3188_v10 = vcombine.high %v93_v4, %v97_v6  ;;  %v101_v13 = vld [vmem:[#allocation3 + $0x48] sm:$0xff]  ;;  %v98_v17 = vld [vmem:[#allocation3 + $0x30] sm:$0xff]  ;;  %v110_v3 = vlaneseq }
  0x3e   :  { %v104_v9 = vld [vmem:[#allocation3 + $0x60] sm:$0xff]  ;;  %v3187_v11 = vcombine.low %v93_v4, %v97_v6  ;;  %v105_v14 = vld [vmem:[#allocation3 + $0x68] sm:$0xff]  ;;  %v95_v18 = vld [vmem:[#allocation3 + $0x18] sm:$0xff]  ;;  %v3190_v23 = vcombine.high %v94_v16, %v98_v17  ;;  %v3189_v29 = vcombine.low %v94_v16, %v98_v17 }
  0x3f   :  { %v3194_v12 = vcombine.high %v100_v8, %v104_v9  ;;  %234 = vmatprep.subr.bf16.mxu0 %v3186_v5  ;;  %v3196_v15 = vcombine.high %v101_v13, %v105_v14  ;;  %275 = vmatprep.subr.bf16.mxu1 %v3188_v10  ;;  %v3193_v19 = vcombine.low %v100_v8, %v104_v9  ;;  %v99_v20 = vld [vmem:[#allocation3 + $0x38] sm:$0xff]  ;;  %v102_v21 = vld [vmem:[#allocation3 + $0x50] sm:$0xff]  ;;  %v111_v4 = vshrl.u32 %v110_v3, 7 }
  0x40   :  { %235 = vmatpush1.bf16.msra.mxu0 %v3185_v7  ;;  %276 = vmatpush1.bf16.msra.mxu1 %v3187_v11  ;;  %v3195_v22 = vcombine.low %v101_v13, %v105_v14  ;;  %v106_v24 = vld [vmem:[#allocation3 + $0x70] sm:$0xff]  ;;  %v103_v25 = vld [vmem:[#allocation3 + $0x58] sm:$0xff]  ;;  %v3192_v28 = vcombine.high %v95_v18, %v99_v20  ;;  %v3191_v30 = vcombine.low %v95_v18, %v99_v20 }
  0x41   :  { %236 = vmatprep.subr.bf16.mxu0 %v3194_v12  ;;  %v107_v26 = vld [vmem:[#allocation3 + $0x78] sm:$0xff]  ;;  %277 = vmatprep.subr.bf16.mxu1 %v3196_v15  ;;  %v3198_v31 = vcombine.high %v102_v21, %v106_v24  ;;  %v3197_v33 = vcombine.low %v102_v21, %v106_v24  ;;  %v3571_v35 = vld [vmem:[#allocation6] ss:$16 sps:$4 sm:$0xff]   ;;  %v3573_v36 = vld [vmem:[#allocation6 + $0x4] ss:$16 sps:$4 sm:$0xff]   ;;  %v4311_v5 = vsub.s32 0, %v111_v4 }
  0x42   :  { %v91_v27 = vld [vmem:[%s4540_s0] sm:$0xf]  ;;  %v3200_v32 = vcombine.high %v103_v25, %v107_v26  ;;  %v3199_v34 = vcombine.low %v103_v25, %v107_v26  ;;  %v3576_v38 = vld [vmem:[#allocation6 + $0x204] ss:$16 sps:$4 sm:$0xff]   ;;  %v4316_v7 = vsub.s32 2, %v111_v4  ;;  %v4318_v8 = vsub.s32 1, %v111_v4 }
  0x43   :  { %v3574_v37 = vld [vmem:[#allocation6 + $0x200] ss:$16 sps:$4 sm:$0xff]   ;;  %v3579_v39 = vld [vmem:[#allocation6 + $0x24] ss:$16 sps:$4 sm:$0xff]   ;;  %v4320_v9 = vsub.s32 3, %v111_v4  ;;  %v4326_v18 = vsub.s32 4, %v111_v4 }
  0x44   :  { %237 = vmatpush1.bf16.msra.mxu0 %v3193_v19  ;;  %278 = vmatpush1.bf16.msra.mxu1 %v3195_v22  ;;  %v3582_v40 = vld [vmem:[#allocation6 + $0x224] ss:$16 sps:$4 sm:$0xff]   ;;  %v3577_v41 = vld [vmem:[#allocation6 + $0x20] ss:$16 sps:$4 sm:$0xff]   ;;  %v4330_v24 = vsub.s32 6, %v111_v4 }
  0x45   :  { %316 = vmatprep.subr.bf16.mxu0 %v3190_v23  ;;  %357 = vmatprep.subr.bf16.mxu1 %v3192_v28  ;;  %v3580_v42 = vld [vmem:[#allocation6 + $0x220] ss:$16 sps:$4 sm:$0xff]   ;;  %v3585_v43 = vld [vmem:[#allocation6 + $0x44] ss:$16 sps:$4 sm:$0xff]   ;;  %v4328_v23 = vsub.s32 5, %v111_v4 }
  0x46   :  { %v3588_v44 = vld [vmem:[#allocation6 + $0x244] ss:$16 sps:$4 sm:$0xff]   ;;  %v3583_v45 = vld [vmem:[#allocation6 + $0x40] ss:$16 sps:$4 sm:$0xff]  }
  0x47   :  { %3201 = vmatmul.mubr.msk.bf16.vlgmr.msra.gmra.mrb[0].mxu0 %vm230_vm0, %v91_v27  ;;  %3202 = vmatmul.mubr.msk.bf16.vlgmr.msra.gmra.mrb[0].mxu1 %vm230_vm0, %v91_v27  ;;  %v3586_v46 = vld [vmem:[#allocation6 + $0x240] ss:$16 sps:$4 sm:$0xff]   ;;  %v3591_v47 = vld [vmem:[#allocation6 + $0x64] ss:$16 sps:$4 sm:$0xff]  }
  0x48   :  { %317 = vmatpush1.bf16.msra.mxu0 %v3189_v29  ;;  %358 = vmatpush1.bf16.msra.mxu1 %v3191_v30  ;;  %v3594_v48 = vld [vmem:[#allocation6 + $0x264] ss:$16 sps:$4 sm:$0xff]   ;;  %v3589_v49 = vld [vmem:[#allocation6 + $0x60] ss:$16 sps:$4 sm:$0xff]   ;;  %v4332_v29 = vsub.s32 7, %v111_v4 }
  0x49   :  { %318 = vmatprep.subr.bf16.mxu0 %v3198_v31  ;;  %348 = vmatprep.mubr.bf16.mxu0 %v4188_v1  ;;  %v3592_v50 = vld [vmem:[#allocation6 + $0x260] ss:$16 sps:$4 sm:$0xff]   ;;  %v3597_v51 = vld [vmem:[#allocation6 + $0x84] ss:$16 sps:$4 sm:$0xff]  }
  0x4a   :  { %359 = vmatprep.subr.bf16.mxu1 %v3200_v32  ;;  %389 = vmatprep.mubr.bf16.mxu1 %v4188_v1  ;;  %v3600_v52 = vld [vmem:[#allocation6 + $0x284] ss:$16 sps:$4 sm:$0xff]   ;;  %v3595_v53 = vld [vmem:[#allocation6 + $0x80] ss:$16 sps:$4 sm:$0xff]  }
  0x4b   :  { %v3598_v54 = vld [vmem:[#allocation6 + $0x280] ss:$16 sps:$4 sm:$0xff]   ;;  %v3603_v55 = vld [vmem:[#allocation6 + $0xa4] ss:$16 sps:$4 sm:$0xff]  }
  0x4c   :  { %319 = vmatpush1.bf16.msra.mxu0 %v3197_v33  ;;  %360 = vmatpush1.bf16.msra.mxu1 %v3199_v34  ;;  %v3606_v56 = vld [vmem:[#allocation6 + $0x2a4] ss:$16 sps:$4 sm:$0xff]   ;;  %v3601_v57 = vld [vmem:[#allocation6 + $0xa0] ss:$16 sps:$4 sm:$0xff]  }
  0x4d   :  { %2212 = vmatprep.subr.bf16.mxu1 %v3573_v36  ;;  %2253 = vmatprep.subr.bf16.mxu0 %v3576_v38  ;;  %v3604_v58 = vld [vmem:[#allocation6 + $0x2a0] ss:$16 sps:$4 sm:$0xff]   ;;  %v3609_v59 = vld [vmem:[#allocation6 + $0xc4] ss:$16 sps:$4 sm:$0xff]  }
  0x4e   :  { %v3612_v60 = vld [vmem:[#allocation6 + $0x2c4] ss:$16 sps:$4 sm:$0xff]   ;;  %v3607_v61 = vld [vmem:[#allocation6 + $0xc0] ss:$16 sps:$4 sm:$0xff]  }
  0x4f   :  { %3203 = vmatmul.mubr.msk.bf16.vlgmr.msra.gmra.mrb[4].mxu0 %vm230_vm0, %v91_v27  ;;  %3204 = vmatmul.mubr.msk.bf16.vlgmr.msra.gmra.mrb[4].mxu1 %vm230_vm0, %v91_v27  ;;  %v3610_v62 = vld [vmem:[#allocation6 + $0x2c0] ss:$16 sps:$4 sm:$0xff]   ;;  %v3615_v63 = vld [vmem:[#allocation6 + $0xe4] ss:$16 sps:$4 sm:$0xff]  }
  0x50   :  { %2213 = vmatpush1.bf16.msra.mxu1 %v3571_v35  ;;  %2254 = vmatpush1.bf16.msra.mxu0 %v3574_v37  ;;  %v3618_v0 = vld [vmem:[#allocation6 + $0x2e4] ss:$16 sps:$4 sm:$0xff]   ;;  %v3613_v1 = vld [vmem:[#allocation6 + $0xe0] ss:$16 sps:$4 sm:$0xff]  }
  0x51   :  { %2214 = vmatprep.subr.bf16.mxu1 %v3579_v39  ;;  %2255 = vmatprep.subr.bf16.mxu0 %v3582_v40  ;;  %v3616_v2 = vld [vmem:[#allocation6 + $0x2e0] ss:$16 sps:$4 sm:$0xff]  }
  0x52   :  { %v108_v6 = vld [vmem:[%s4542_s2] sm:$0xff] }
  0x53   :  { %v113_v10 = vrot.slane %v108_v6, %v4311_v5  ;;  %v121_v11 = vrot.slane %v108_v6, %v4316_v7  ;;  %v117_v12 = vrot.slane %v108_v6, %v4318_v8  ;;  %v125_v13 = vrot.slane %v108_v6, %v4320_v9 }
  0x54   :  { %2215 = vmatpush1.bf16.msra.mxu1 %v3577_v41  ;;  %2256 = vmatpush1.bf16.msra.mxu0 %v3580_v42  ;;  %v129_v34 = vrot.slane %v108_v6, %v4326_v18  ;;  %v133_v35 = vrot.slane %v108_v6, %v4328_v23  ;;  %v137_v36 = vrot.slane %v108_v6, %v4330_v24 }
  0x55   :  { %2216 = vmatprep.subr.bf16.mxu1 %v3585_v43  ;;  %2257 = vmatprep.subr.bf16.mxu0 %v3588_v44  ;;  %v141_v37 = vrot.slane %v108_v6, %v4332_v29 }
  0x58   :  { %2217 = vmatpush1.bf16.msra.mxu1 %v3583_v45  ;;  %2258 = vmatpush1.bf16.msra.mxu0 %v3586_v46 }
  0x59   :  { %2218 = vmatprep.subr.bf16.mxu1 %v3591_v47  ;;  %2259 = vmatprep.subr.bf16.mxu0 %v3594_v48 }
  0x5c   :  { %2219 = vmatpush1.bf16.msra.mxu1 %v3589_v49  ;;  %2260 = vmatpush1.bf16.msra.mxu0 %v3592_v50 }
  0x5d   :  { %2220 = vmatprep.subr.bf16.mxu1 %v3597_v51  ;;  %2261 = vmatprep.subr.bf16.mxu0 %v3600_v52 }
  0x60   :  { %2221 = vmatpush1.bf16.msra.mxu1 %v3595_v53  ;;  %2262 = vmatpush1.bf16.msra.mxu0 %v3598_v54 }
  0x61   :  { %2222 = vmatprep.subr.bf16.mxu1 %v3603_v55  ;;  %2263 = vmatprep.subr.bf16.mxu0 %v3606_v56 }
  0x64   :  { %2223 = vmatpush1.bf16.msra.mxu1 %v3601_v57  ;;  %2264 = vmatpush1.bf16.msra.mxu0 %v3604_v58 }
  0x65   :  { %2224 = vmatprep.subr.bf16.mxu1 %v3609_v59  ;;  %2265 = vmatprep.subr.bf16.mxu0 %v3612_v60 }
  0x68   :  { %2225 = vmatpush1.bf16.msra.mxu1 %v3607_v61  ;;  %2266 = vmatpush1.bf16.msra.mxu0 %v3610_v62 }
  0x69   :  { %2226 = vmatprep.subr.bf16.mxu1 %v3615_v63  ;;  %2267 = vmatprep.subr.bf16.mxu0 %v3618_v0 }
  0x6c   :  { %2227 = vmatpush1.bf16.msra.mxu1 %v3613_v1  ;;  %2268 = vmatpush1.bf16.msra.mxu0 %v3616_v2 }
 0x11a   :  { %v268_v14 = vpop.f32.mrb[0].mxu0  ;;  %v309_v16 = vpop.f32.mrb[0].mxu1 }
 0x11b   :  { %v269_v15 = vadd.f32 %v268_v14, %v113_v10  ;;  %v270_v17 = vpop.f32.mrb[1].mxu0  ;;  %v310_v19 = vadd.f32 %v309_v16, %v121_v11  ;;  %v311_v21 = vpop.f32.mrb[1].mxu1 }
 0x11c   :  { %v271_v20 = vadd.f32 %v270_v17, %v117_v12  ;;  %v272_v22 = vpop.f32.mrb[2].mxu0  ;;  %v312_v26 = vadd.f32 %v311_v21, %v125_v13  ;;  %v313_v27 = vpop.f32.mrb[2].mxu1 }
 0x11d   :  { %v398_v25 = vmul.f32 0.5, %v269_v15  ;;  %v273_v28 = vpop.f32.mrb[3].mxu0  ;;  %v400_v30 = vmul.f32 0.5, %v310_v19  ;;  %v314_v32 = vpop.f32.mrb[3].mxu1 }
 0x11e   :  { %v399_v31 = vmul.f32 0.5, %v271_v20  ;;  %v401_v33 = vmul.f32 0.5, %v312_v26 }
 0x11f   :  { %4051 = vtanh.f32 %v398_v25 }
 0x120   :  { %4053 = vtanh.f32 %v400_v30 }
 0x121   :  { %4055 = vtanh.f32 %v399_v31 }
 0x122   :  { %4057 = vtanh.f32 %v401_v33  ;;  %v350_v38 = vpop.f32.mrb[4].mxu0  ;;  %v391_v41 = vpop.f32.mrb[4].mxu1 }
 0x123   :  { %v351_v39 = vadd.f32 %v350_v38, %v129_v34  ;;  %v352_v40 = vpop.f32.mrb[5].mxu0  ;;  %v392_v43 = vadd.f32 %v391_v41, %v137_v36  ;;  %v393_v44 = vpop.f32.mrb[5].mxu1 }
 0x124   :  { %v353_v42 = vadd.f32 %v352_v40, %v133_v35  ;;  %v354_v45 = vpop.f32.mrb[6].mxu0  ;;  %v394_v47 = vadd.f32 %v393_v44, %v141_v37  ;;  %v395_v49 = vpop.f32.mrb[6].mxu1  ;;  %v3622_v44 = vld [vmem:[#allocation6 + $0x300] ss:$16 sps:$4 sm:$0xff]  }
 0x125   :  { %v402_v46 = vmul.f32 0.5, %v351_v39  ;;  %v355_v48 = vpop.f32.mrb[7].mxu0  ;;  %v404_v51 = vmul.f32 0.5, %v392_v43  ;;  %v396_v52 = vpop.f32.mrb[7].mxu1  ;;  %v3621_v43 = vld [vmem:[#allocation6 + $0x104] ss:$16 sps:$4 sm:$0xff]  }
 0x126   :  { %v403_v50 = vmul.f32 0.5, %v353_v42  ;;  %v405_v53 = vmul.f32 0.5, %v394_v47  ;;  %v3619_v42 = vld [vmem:[#allocation6 + $0x100] ss:$16 sps:$4 sm:$0xff]   ;;  %v3624_v45 = vld [vmem:[#allocation6 + $0x304] ss:$16 sps:$4 sm:$0xff]   ;;  %2228 = vmatprep.subr.bf16.mxu1 %v3621_v43 }
 0x127   :  { %4059 = vtanh.f32 %v402_v46  ;;  %2269 = vmatprep.subr.bf16.mxu0 %v3624_v45  ;;  %2229 = vmatpush1.bf16.msra.mxu1 %v3619_v42  ;;  %v3630_v47 = vld [vmem:[#allocation6 + $0x324] ss:$16 sps:$4 sm:$0xff]   ;;  %v3625_v48 = vld [vmem:[#allocation6 + $0x120] ss:$16 sps:$4 sm:$0xff]  }
 0x128   :  { %4061 = vtanh.f32 %v403_v50  ;;  %2270 = vmatpush1.bf16.msra.mxu0 %v3622_v44  ;;  %v3628_v49 = vld [vmem:[#allocation6 + $0x320] ss:$16 sps:$4 sm:$0xff]  }
 0x129   :  { %v4052_v54 = vpop.eup %4051  ;;  %4063 = vtanh.f32 %v404_v51  ;;  %2271 = vmatprep.subr.bf16.mxu0 %v3630_v47  ;;  %v3631_v52 = vld [vmem:[#allocation6 + $0x140] ss:$16 sps:$4 sm:$0xff]  }
 0x12a   :  { %v4054_v55 = vpop.eup %4053  ;;  %v414_v56 = vadd.f32 1.0, %v4052_v54  ;;  %4065 = vtanh.f32 %v405_v53  ;;  %v3639_v54 = vld [vmem:[#allocation6 + $0x164] ss:$16 sps:$4 sm:$0xff]  }
 0x12b   :  { %v4056_v57 = vpop.eup %4055  ;;  %v416_v58 = vadd.f32 1.0, %v4054_v55  ;;  %v3642_v55 = vld [vmem:[#allocation6 + $0x364] ss:$16 sps:$4 sm:$0xff]  }
 0x12c   :  { %v4058_v59 = vpop.eup %4057  ;;  %v4338_v60 = vmul.f32 %v414_v56, %v398_v25  ;;  %v415_v61 = vadd.f32 1.0, %v4056_v57  ;;  %2272 = vmatpush1.bf16.msra.mxu0 %v3628_v49  ;;  %v3637_v56 = vld [vmem:[#allocation6 + $0x160] ss:$16 sps:$4 sm:$0xff]  }
 0x12d   :  { %v417_v62 = vadd.f32 1.0, %v4058_v59  ;;  %v4340_v63 = vmul.f32 %v416_v58, %v400_v30  ;;  %v3640_v57 = vld [vmem:[#allocation6 + $0x360] ss:$16 sps:$4 sm:$0xff]   ;;  %v3645_v58 = vld [vmem:[#allocation6 + $0x184] ss:$16 sps:$4 sm:$0xff]  }
 0x12e   :  { %v4342_v0 = vmul.f32 %v415_v61, %v399_v31  ;;  %v439_v1 = vmul.f32 %v4338_v60, %v4338_v60  ;;  %v3648_v59 = vld [vmem:[#allocation6 + $0x384] ss:$16 sps:$4 sm:$0xff]   ;;  %v3643_v61 = vld [vmem:[#allocation6 + $0x180] ss:$16 sps:$4 sm:$0xff]  }
 0x12f   :  { %v4350_v6 = vmul.f32 %v417_v62, %v401_v33  ;;  %v441_v13 = vmul.f32 %v4340_v63, %v4340_v63  ;;  %v3646_v62 = vld [vmem:[#allocation6 + $0x380] ss:$16 sps:$4 sm:$0xff]  }
 0x130   :  { %v432_v2 = vadd.f32 %v4342_v0, %v4338_v60  ;;  %v440_v3 = vmul.f32 %v4342_v0, %v4342_v0  ;;  %v430_v42 = vld [vmem:[%s4543_s3] sm:$0xff] }
 0x131   :  { %v4060_v4 = vpop.eup %4059  ;;  %v442_v28 = vmul.f32 %v4350_v6, %v4350_v6  ;;  %v532_v45 = vrot.slane %v430_v42, %v4318_v8  ;;  %v540_v47 = vrot.slane %v430_v42, %v4320_v9  ;;  %v536_v49 = vrot.slane %v430_v42, %v4316_v7 }
 0x132   :  { %v4062_v10 = vpop.eup %4061  ;;  %v418_v11 = vadd.f32 1.0, %v4060_v4  ;;  %v433_v12 = vadd.f32 %v432_v2, %v4340_v63  ;;  %v443_v14 = vadd.f32 %v440_v3, %v439_v1  ;;  %v3649_v1 = vld [vmem:[#allocation6 + $0x1a0] ss:$16 sps:$4 sm:$0xff]   ;;  %v3651_v2 = vld [vmem:[#allocation6 + $0x1a4] ss:$16 sps:$4 sm:$0xff]  }
 0x133   :  { %v4064_v15 = vpop.eup %4063  ;;  %v419_v16 = vadd.f32 1.0, %v4062_v10  ;;  %v3652_v3 = vld [vmem:[#allocation6 + $0x3a0] ss:$16 sps:$4 sm:$0xff]   ;;  %v3654_v4 = vld [vmem:[#allocation6 + $0x3a4] ss:$16 sps:$4 sm:$0xff]  }
 0x134   :  { %v4066_v17 = vpop.eup %4065  ;;  %v4355_v19 = vmul.f32 %v418_v11, %v402_v46  ;;  %v420_v20 = vadd.f32 1.0, %v4064_v15  ;;  %v434_v21 = vadd.f32 %v433_v12, %v4350_v6  ;;  %v444_v22 = vadd.f32 %v443_v14, %v441_v13  ;;  %v3627_v46 = vld [vmem:[#allocation6 + $0x124] ss:$16 sps:$4 sm:$0xff]   ;;  %v3655_v12 = vld [vmem:[#allocation6 + $0x1c0] ss:$16 sps:$4 sm:$0xff]  }
 0x135   :  { %v4358_v25 = vmul.f32 %v419_v16, %v403_v50  ;;  %v421_v26 = vadd.f32 1.0, %v4066_v17  ;;  %2230 = vmatprep.subr.bf16.mxu1 %v3627_v46  ;;  %v3633_v50 = vld [vmem:[#allocation6 + $0x144] ss:$16 sps:$4 sm:$0xff]   ;;  %v3658_v13 = vld [vmem:[#allocation6 + $0x3c0] ss:$16 sps:$4 sm:$0xff]  }
 0x136   :  { %v4360_v27 = vmul.f32 %v420_v20, %v404_v51  ;;  %435 = vadd.xlane.f32.xlu0 %v434_v21  ;;  %v460_v30 = vmul.f32 %v4355_v19, %v4355_v19  ;;  %v445_v34 = vadd.f32 %v444_v22, %v442_v28  ;;  %2231 = vmatpush1.bf16.msra.mxu1 %v3625_v48  ;;  %v3636_v51 = vld [vmem:[#allocation6 + $0x344] ss:$16 sps:$4 sm:$0xff]   ;;  %v3661_v16 = vld [vmem:[#allocation6 + $0x1e0] ss:$16 sps:$4 sm:$0xff]   ;;  %v3672_v21 = vld [vmem:[#allocation6 + $0xc] ss:$16 sps:$4 sm:$0xff]  }
 0x137   :  { %v4366_v31 = vmul.f32 %v421_v26, %v405_v53  ;;  %v454_v32 = vadd.f32 %v4358_v25, %v4355_v19  ;;  %v461_v33 = vmul.f32 %v4358_v25, %v4358_v25  ;;  %v3634_v53 = vld [vmem:[#allocation6 + $0x340] ss:$16 sps:$4 sm:$0xff]   ;;  %2232 = vmatprep.subr.bf16.mxu1 %v3633_v50  ;;  %2273 = vmatprep.subr.bf16.mxu0 %v3636_v51  ;;  %v3657_v10 = vld [vmem:[#allocation6 + $0x1c4] ss:$16 sps:$4 sm:$0xff]  }
 0x138   :  { %v462_v35 = vmul.f32 %v4360_v27, %v4360_v27  ;;  %2274 = vmatpush1.bf16.msra.mxu0 %v3634_v53  ;;  %v3660_v11 = vld [vmem:[#allocation6 + $0x3c4] ss:$16 sps:$4 sm:$0xff]   ;;  %v3664_v17 = vld [vmem:[#allocation6 + $0x3e0] ss:$16 sps:$4 sm:$0xff]   ;;  %v528_v48 = vrot.slane %v430_v42, %v4311_v5 }
 0x139   :  { %v455_v36 = vadd.f32 %v454_v32, %v4360_v27  ;;  %v463_v37 = vmul.f32 %v4366_v31, %v4366_v31  ;;  %v464_v38 = vadd.f32 %v461_v33, %v460_v30  ;;  %2275 = vmatprep.subr.bf16.mxu0 %v3642_v55  ;;  %v3663_v14 = vld [vmem:[#allocation6 + $0x1e4] ss:$16 sps:$4 sm:$0xff]  }
 0x13a   :  { %446 = vadd.xlane.f32.xlu0 %v445_v34  ;;  %2233 = vmatpush1.bf16.msra.mxu1 %v3631_v52  ;;  %v3666_v15 = vld [vmem:[#allocation6 + $0x3e4] ss:$16 sps:$4 sm:$0xff]  }
 0x13b   :  { %v456_v39 = vadd.f32 %v455_v36, %v4366_v31  ;;  %v465_v40 = vadd.f32 %v464_v38, %v462_v35  ;;  %2234 = vmatprep.subr.bf16.mxu1 %v3639_v54  ;;  %v3669_v20 = vld [vmem:[#allocation6 + $0x404] ss:$16 sps:$4 sm:$0xff]  }
 0x13c   :  { %2276 = vmatpush1.bf16.msra.mxu0 %v3640_v57  ;;  %v4389_v46 = vld [vmem:[%s4544_s4] sm:$0xff] }
 0x13d   :  { %457 = vadd.xlane.f32.xlu1 %v456_v39  ;;  %v466_v41 = vadd.f32 %v465_v40, %v463_v37  ;;  %2277 = vmatprep.subr.bf16.mxu0 %v3648_v59  ;;  %v597_v51 = vrot.slane %v4389_v46, %v4318_v8  ;;  %v605_v52 = vrot.slane %v4389_v46, %v4320_v9 }
 0x13e   :  { %2235 = vmatpush1.bf16.msra.mxu1 %v3637_v56  ;;  %v593_v57 = vrot.slane %v4389_v46, %v4311_v5  ;;  %v544_v59 = vrot.slane %v430_v42, %v4326_v18 }
 0x13f   :  { %2236 = vmatprep.subr.bf16.mxu1 %v3645_v58  ;;  %v601_v58 = vrot.slane %v4389_v46, %v4316_v7 }
 0x140   :  { %2278 = vmatpush1.bf16.msra.mxu0 %v3646_v62 }
 0x141   :  { %467 = vadd.xlane.f32.xlu1 %v466_v41  ;;  %2279 = vmatprep.subr.bf16.mxu0 %v3654_v4  ;;  %v548_v4 = vrot.slane %v430_v42, %v4328_v23 }
 0x142   :  { %2237 = vmatpush1.bf16.msra.mxu1 %v3643_v61  ;;  %v552_v61 = vrot.slane %v430_v42, %v4330_v24 }
 0x143   :  { %2238 = vmatprep.subr.bf16.mxu1 %v3651_v2 }
 0x144   :  { %2280 = vmatpush1.bf16.msra.mxu0 %v3652_v3 }
 0x145   :  { %2281 = vmatprep.subr.bf16.mxu0 %v3660_v11 }
 0x146   :  { %2239 = vmatpush1.bf16.msra.mxu1 %v3649_v1 }
 0x147   :  { %2240 = vmatprep.subr.bf16.mxu1 %v3657_v10  ;;  %v556_v10 = vrot.slane %v430_v42, %v4332_v29  ;;  %v617_v42 = vrot.slane %v4389_v46, %v4330_v24 }
 0x148   :  { %2282 = vmatpush1.bf16.msra.mxu0 %v3658_v13 }
 0x149   :  { %2283 = vmatprep.subr.bf16.mxu0 %v3666_v15 }
 0x14a   :  { %2241 = vmatpush1.bf16.msra.mxu1 %v3655_v12 }
 0x14b   :  { %2242 = vmatprep.subr.bf16.mxu1 %v3663_v14 }
 0x14c   :  { %2284 = vmatpush1.bf16.msra.mxu0 %v3664_v17 }
 0x14d   :  { %2294 = vmatprep.subr.bf16.mxu0 %v3669_v20 }
 0x14e   :  { %2243 = vmatpush1.bf16.msra.mxu1 %v3661_v16 }
 0x14f   :  { %2376 = vmatprep.subr.bf16.mxu1 %v3672_v21 }
 0x1c3   :  { %v436_v22 = vpop.xlane.xlu0 %435 }
 0x1c4   :  { %v438_v26 = vmul.f32 0.001953125, %v436_v22  ;;  %v609_v22 = vrot.slane %v4389_v46, %v4326_v18  ;;  %v3675_v18 = vld [vmem:[#allocation6 + $0x424] ss:$16 sps:$4 sm:$0xff]  }
 0x1c6   :  { %v449_v30 = vmul.f32 %v438_v26, %v438_v26 }
 0x1c7   :  { %v447_v28 = vpop.xlane.xlu0 %446 }
 0x1c8   :  { %v448_v32 = vmul.f32 0.001953125, %v447_v28 }
 0x1ca   :  { %v450_v33 = vsub.f32 %v448_v32, %v449_v30  ;;  %v458_v34 = vpop.xlane.xlu1 %457  ;;  %v613_v30 = vrot.slane %v4389_v46, %v4328_v23  ;;  %v621_v23 = vrot.slane %v4389_v46, %v4332_v29  ;;  %v3673_v29 = vld [vmem:[#allocation6 + $0x420] ss:$16 sps:$4 sm:$0xff]  }
 0x1cb   :  { %v4378_v35 = vmul.f32 0.001953125, %v458_v34 }
 0x1cc   :  { %v451_v36 = vmax.f32 %v450_v33, 0.0 }
 0x1cd   :  { %v470_v37 = vmul.f32 %v4378_v35, %v4378_v35 }
 0x1ce   :  { %v452_v38 = vadd.f32 1e-05, %v451_v36  ;;  %v468_v39 = vpop.xlane.xlu1 %467 }
 0x1cf   :  { %v469_v40 = vmul.f32 0.001953125, %v468_v39 }
 0x1d0   :  { %4067 = vrsqrt.f32 %v452_v38 }
 0x1d1   :  { %v471_v41 = vsub.f32 %v469_v40, %v470_v37  ;;  %v3670_v37 = vld [vmem:[#allocation6 + $0x8] ss:$16 sps:$4 sm:$0xff]  }
 0x1d3   :  { %v472_v43 = vmax.f32 %v471_v41, 0.0 }
 0x1d5   :  { %v473_v44 = vadd.f32 1e-05, %v472_v43  ;;  %v3678_v43 = vld [vmem:[#allocation6 + $0x2c] ss:$16 sps:$4 sm:$0xff]  }
 0x1d7   :  { %4069 = vrsqrt.f32 %v473_v44 }
 0x1da   :  { %v4068_v50 = vpop.eup %4067 }
 0x1db   :  { %v566_v53 = vmul.f32 %v4068_v50, %v532_v45  ;;  %v568_v54 = vmul.f32 %v4068_v50, %v540_v47  ;;  %v565_v55 = vmul.f32 %v4068_v50, %v528_v48  ;;  %v567_v56 = vmul.f32 %v4068_v50, %v536_v49  ;;  %v3676_v49 = vld [vmem:[#allocation6 + $0x28] ss:$16 sps:$4 sm:$0xff]  }
 0x1dd   :  { %v582_v62 = vmul.f32 %v566_v53, %v438_v26  ;;  %v584_v1 = vmul.f32 %v568_v54, %v438_v26  ;;  %v581_v2 = vmul.f32 %v565_v55, %v438_v26  ;;  %v583_v3 = vmul.f32 %v567_v56, %v438_v26 }
 0x1de   :  { %v574_v11 = vmul.f32 %v566_v53, %v4342_v0  ;;  %v576_v13 = vmul.f32 %v568_v54, %v4350_v6  ;;  %v573_v15 = vmul.f32 %v565_v55, %v4338_v60  ;;  %v575_v17 = vmul.f32 %v567_v56, %v4340_v63  ;;  %v3667_v60 = vld [vmem:[#allocation6 + $0x400] ss:$16 sps:$4 sm:$0xff]  }
 0x1df   :  { %v631_v12 = vsub.f32 %v597_v51, %v582_v62  ;;  %v633_v14 = vsub.f32 %v605_v52, %v584_v1  ;;  %v630_v16 = vsub.f32 %v593_v57, %v581_v2  ;;  %v632_v20 = vsub.f32 %v601_v58, %v583_v3  ;;  %v3681_v51 = vld [vmem:[#allocation6 + $0x444] ss:$16 sps:$4 sm:$0xff]   ;;  %v3690_v62 = vld [vmem:[#allocation6 + $0x6c] ss:$16 sps:$4 sm:$0xff]   ;;  %v3688_v1 = vld [vmem:[#allocation6 + $0x68] ss:$16 sps:$4 sm:$0xff]  }
 0x1e0   :  { %v3693_v2 = vld [vmem:[#allocation6 + $0x484] ss:$16 sps:$4 sm:$0xff]   ;;  %v3696_v3 = vld [vmem:[#allocation6 + $0x8c] ss:$16 sps:$4 sm:$0xff]  }
 0x1e1   :  { %v4070_v21 = vpop.eup %4069  ;;  %v639_v26 = vadd.f32 %v631_v12, %v574_v11  ;;  %v641_v28 = vadd.f32 %v633_v14, %v576_v13  ;;  %v638_v0 = vadd.f32 %v630_v16, %v573_v15  ;;  %v640_v32 = vadd.f32 %v632_v20, %v575_v17  ;;  %v3699_v11 = vld [vmem:[#allocation6 + $0x4a4] ss:$16 sps:$4 sm:$0xff]   ;;  %v3702_v12 = vld [vmem:[#allocation6 + $0xac] ss:$16 sps:$4 sm:$0xff]   ;;  %v3697_v13 = vld [vmem:[#allocation6 + $0x4a0] ss:$16 sps:$4 sm:$0xff]  }
 0x1e2   :  { %v570_v33 = vmul.f32 %v4070_v21, %v548_v4  ;;  %v569_v6 = vmul.f32 %v4070_v21, %v544_v59  ;;  %v572_v63 = vmul.f32 %v4070_v21, %v556_v10  ;;  %v571_v38 = vmul.f32 %v4070_v21, %v552_v61  ;;  %v3682_v59 = vld [vmem:[#allocation6 + $0x48] ss:$16 sps:$4 sm:$0xff]   ;;  %v3691_v4 = vld [vmem:[#allocation6 + $0x480] ss:$16 sps:$4 sm:$0xff]   ;;  %v3705_v15 = vld [vmem:[#allocation6 + $0x4c4] ss:$16 sps:$4 sm:$0xff]  }
 0x1e3   :  { %v647_v34 = vpack.c.bf16 %v639_v26, %v639_v26  ;;  %v4414_v36 = vpack.c.bf16 %v641_v28, %v641_v28  ;;  %v4416_v39 = vpack.c.bf16 %v638_v0, %v638_v0  ;;  %v4418_v40 = vpack.c.bf16 %v640_v32, %v640_v32  ;;  %v3694_v10 = vld [vmem:[#allocation6 + $0x88] ss:$16 sps:$4 sm:$0xff]   ;;  %v3708_v16 = vld [vmem:[#allocation6 + $0xcc] ss:$16 sps:$4 sm:$0xff]   ;;  %v3703_v17 = vld [vmem:[#allocation6 + $0x4c0] ss:$16 sps:$4 sm:$0xff]  }
 0x1e4   :  { %v586_v41 = vmul.f32 %v570_v33, %v4378_v35  ;;  %v585_v44 = vmul.f32 %v569_v6, %v4378_v35  ;;  %v578_v45 = vmul.f32 %v570_v33, %v4358_v25  ;;  %v588_v48 = vmul.f32 %v572_v63, %v4378_v35  ;;  %v3684_v25 = vld [vmem:[#allocation6 + $0x4c] ss:$16 sps:$4 sm:$0xff]   ;;  %v3700_v14 = vld [vmem:[#allocation6 + $0xa8] ss:$16 sps:$4 sm:$0xff]   ;;  %v3711_v21 = vld [vmem:[#allocation6 + $0x4e4] ss:$16 sps:$4 sm:$0xff]  }
 0x1e5   :  { %2244 = vmatprep.mubr.bf16.mxu1 %v647_v34  ;;  %2285 = vmatprep.mubr.bf16.mxu0 %v4414_v36  ;;  %v577_v24 = vmul.f32 %v569_v6, %v4355_v19  ;;  %v587_v50 = vmul.f32 %v571_v38, %v4378_v35  ;;  %v580_v53 = vmul.f32 %v572_v63, %v4366_v31  ;;  %v3679_v35 = vld [vmem:[#allocation6 + $0x440] ss:$16 sps:$4 sm:$0xff]   ;;  %v3687_v31 = vld [vmem:[#allocation6 + $0x464] ss:$16 sps:$4 sm:$0xff]   ;;  %v3706_v20 = vld [vmem:[#allocation6 + $0xc8] ss:$16 sps:$4 sm:$0xff]  }
 0x1e6   :  { %2245 = vmatmul.mubr.bf16.vlgmr.msra.gmra.mrb[8].mxu1 %v4416_v39  ;;  %2286 = vmatmul.mubr.bf16.vlgmr.msra.gmra.mrb[8].mxu0 %v4418_v40  ;;  %v635_v47 = vsub.f32 %v613_v30, %v586_v41  ;;  %v634_v46 = vsub.f32 %v609_v22, %v585_v44  ;;  %v637_v54 = vsub.f32 %v621_v23, %v588_v48  ;;  %v3714_v22 = vld [vmem:[#allocation6 + $0xec] ss:$16 sps:$4 sm:$0xff]   ;;  %v3709_v26 = vld [vmem:[#allocation6 + $0x4e0] ss:$16 sps:$4 sm:$0xff]   ;;  %v3712_v28 = vld [vmem:[#allocation6 + $0xe8] ss:$16 sps:$4 sm:$0xff]  }
 0x1e7   :  { %2295 = vmatpush1.bf16.msra.mxu0 %v3667_v60  ;;  %2377 = vmatpush1.bf16.msra.mxu1 %v3670_v37  ;;  %v579_v56 = vmul.f32 %v571_v38, %v4360_v27  ;;  %v636_v57 = vsub.f32 %v617_v42, %v587_v50  ;;  %v3685_v27 = vld [vmem:[#allocation6 + $0x460] ss:$16 sps:$4 sm:$0xff]   ;;  %v3717_v30 = vld [vmem:[#allocation6 + $0x504] ss:$16 sps:$4 sm:$0xff]   ;;  %v3720_v0 = vld [vmem:[#allocation6 + $0x10c] ss:$16 sps:$4 sm:$0xff]  }
 0x1e8   :  { %2408 = vmatprep.mubr.bf16.mxu1 %v647_v34  ;;  %2296 = vmatprep.subr.bf16.mxu0 %v3675_v18  ;;  %v643_v52 = vadd.f32 %v635_v47, %v578_v45  ;;  %v4434_v55 = vadd.f32 %v634_v46, %v577_v24  ;;  %v4439_v19 = vadd.f32 %v637_v54, %v580_v53  ;;  %v3715_v32 = vld [vmem:[#allocation6 + $0x500] ss:$16 sps:$4 sm:$0xff]   ;;  %v3718_v33 = vld [vmem:[#allocation6 + $0x108] ss:$16 sps:$4 sm:$0xff]   ;;  %v3723_v6 = vld [vmem:[#allocation6 + $0x524] ss:$16 sps:$4 sm:$0xff]  }
 0x1e9   :  { %2378 = vmatprep.subr.bf16.mxu1 %v3678_v43  ;;  %v4441_v61 = vadd.f32 %v636_v57, %v579_v56  ;;  %v3726_v34 = vld [vmem:[#allocation6 + $0x12c] ss:$16 sps:$4 sm:$0xff]   ;;  %v3721_v60 = vld [vmem:[#allocation6 + $0x520] ss:$16 sps:$4 sm:$0xff]   ;;  %v3724_v37 = vld [vmem:[#allocation6 + $0x128] ss:$16 sps:$4 sm:$0xff]  }
 0x1ea   :  { %v4437_v58 = vpack.c.bf16 %v643_v52, %v643_v52  ;;  %v3729_v63 = vld [vmem:[#allocation6 + $0x544] ss:$16 sps:$4 sm:$0xff]   ;;  %v3732_v38 = vld [vmem:[#allocation6 + $0x14c] ss:$16 sps:$4 sm:$0xff]   ;;  %v3727_v18 = vld [vmem:[#allocation6 + $0x540] ss:$16 sps:$4 sm:$0xff]  }
 0x1eb   :  { %2297 = vmatpush1.bf16.msra.mxu0 %v3673_v29  ;;  %2379 = vmatpush1.bf16.msra.mxu1 %v3676_v49  ;;  %v3730_v41 = vld [vmem:[#allocation6 + $0x148] ss:$16 sps:$4 sm:$0xff]   ;;  %v3735_v23 = vld [vmem:[#allocation6 + $0x564] ss:$16 sps:$4 sm:$0xff]   ;;  %v3738_v42 = vld [vmem:[#allocation6 + $0x16c] ss:$16 sps:$4 sm:$0xff]  }
 0x1ec   :  { %2298 = vmatprep.subr.bf16.mxu0 %v3681_v51  ;;  %2326 = vmatprep.mubr.bf16.mxu0 %v4437_v58  ;;  %v3733_v43 = vld [vmem:[#allocation6 + $0x560] ss:$16 sps:$4 sm:$0xff]   ;;  %v3736_v44 = vld [vmem:[#allocation6 + $0x168] ss:$16 sps:$4 sm:$0xff]   ;;  %v3741_v45 = vld [vmem:[#allocation6 + $0x584] ss:$16 sps:$4 sm:$0xff]  }
 0x1ed   :  { %2380 = vmatprep.subr.bf16.mxu1 %v3684_v25  ;;  %v3744_v47 = vld [vmem:[#allocation6 + $0x18c] ss:$16 sps:$4 sm:$0xff]   ;;  %v3739_v48 = vld [vmem:[#allocation6 + $0x580] ss:$16 sps:$4 sm:$0xff]   ;;  %v3742_v29 = vld [vmem:[#allocation6 + $0x188] ss:$16 sps:$4 sm:$0xff]  }
 0x1ee   :  { %v3747_v49 = vld [vmem:[#allocation6 + $0x5a4] ss:$16 sps:$4 sm:$0xff]   ;;  %v3750_v24 = vld [vmem:[#allocation6 + $0x1ac] ss:$16 sps:$4 sm:$0xff]   ;;  %v3745_v46 = vld [vmem:[#allocation6 + $0x5a0] ss:$16 sps:$4 sm:$0xff]  }
 0x1ef   :  { %2299 = vmatpush1.bf16.msra.mxu0 %v3679_v35  ;;  %2381 = vmatpush1.bf16.msra.mxu1 %v3682_v59  ;;  %v3748_v50 = vld [vmem:[#allocation6 + $0x1a8] ss:$16 sps:$4 sm:$0xff]   ;;  %v3753_v51 = vld [vmem:[#allocation6 + $0x5c4] ss:$16 sps:$4 sm:$0xff]   ;;  %v3756_v52 = vld [vmem:[#allocation6 + $0x1cc] ss:$16 sps:$4 sm:$0xff]  }
 0x1f0   :  { %2300 = vmatprep.subr.bf16.mxu0 %v3687_v31  ;;  %2382 = vmatprep.subr.bf16.mxu1 %v3690_v62  ;;  %v3751_v53 = vld [vmem:[#allocation6 + $0x5c0] ss:$16 sps:$4 sm:$0xff]   ;;  %v3754_v54 = vld [vmem:[#allocation6 + $0x1c8] ss:$16 sps:$4 sm:$0xff]   ;;  %v3759_v25 = vld [vmem:[#allocation6 + $0x5e4] ss:$16 sps:$4 sm:$0xff]  }
 0x1f1   :  { %v3762_v56 = vld [vmem:[#allocation6 + $0x1ec] ss:$16 sps:$4 sm:$0xff]   ;;  %v3757_v57 = vld [vmem:[#allocation6 + $0x5e0] ss:$16 sps:$4 sm:$0xff]   ;;  %v3760_v35 = vld [vmem:[#allocation6 + $0x1e8] ss:$16 sps:$4 sm:$0xff]  }
 0x1f2   :  { %v3765_v59 = vld [vmem:[#allocation6 + $0x604] ss:$16 sps:$4 sm:$0xff]   ;;  %v3768_v31 = vld [vmem:[#allocation6 + $0x20c] ss:$16 sps:$4 sm:$0xff]   ;;  %v3763_v62 = vld [vmem:[#allocation6 + $0x600] ss:$16 sps:$4 sm:$0xff]  }
 0x1f3   :  { %2301 = vmatpush1.bf16.msra.mxu0 %v3685_v27  ;;  %2383 = vmatpush1.bf16.msra.mxu1 %v3688_v1  ;;  %v4446_v27 = vpack.c.bf16 %v4434_v55, %v4434_v55  ;;  %v3766_v1 = vld [vmem:[#allocation6 + $0x208] ss:$16 sps:$4 sm:$0xff]  }
 0x1f4   :  { %2302 = vmatprep.subr.bf16.mxu0 %v3693_v2  ;;  %2384 = vmatprep.subr.bf16.mxu1 %v3696_v3  ;;  %v4450_v2 = vpack.c.bf16 %v4439_v19, %v4439_v19  ;;  %v3771_v3 = vld [vmem:[#allocation6 + $0x624] ss:$16 sps:$4 sm:$0xff]   ;;  %v3772_v55 = vld [vmem:[#allocation6 + $0x228] ss:$16 sps:$4 sm:$0xff]   ;;  %v3775_v19 = vld [vmem:[#allocation6 + $0x640] ss:$16 sps:$4 sm:$0xff]  }
 0x1f7   :  { %2303 = vmatpush1.bf16.msra.mxu0 %v3691_v4  ;;  %2385 = vmatpush1.bf16.msra.mxu1 %v3694_v10  ;;  %v3774_v4 = vld [vmem:[#allocation6 + $0x22c] ss:$16 sps:$4 sm:$0xff]   ;;  %v3769_v10 = vld [vmem:[#allocation6 + $0x620] ss:$16 sps:$4 sm:$0xff]  }
 0x1f8   :  { %2304 = vmatprep.subr.bf16.mxu0 %v3699_v11  ;;  %2386 = vmatprep.subr.bf16.mxu1 %v3702_v12  ;;  %v3777_v11 = vld [vmem:[#allocation6 + $0x644] ss:$16 sps:$4 sm:$0xff]   ;;  %v3780_v12 = vld [vmem:[#allocation6 + $0x24c] ss:$16 sps:$4 sm:$0xff]  }
 0x1fb   :  { %2305 = vmatpush1.bf16.msra.mxu0 %v3697_v13  ;;  %2387 = vmatpush1.bf16.msra.mxu1 %v3700_v14  ;;  %v3778_v13 = vld [vmem:[#allocation6 + $0x248] ss:$16 sps:$4 sm:$0xff]   ;;  %v3783_v14 = vld [vmem:[#allocation6 + $0x664] ss:$16 sps:$4 sm:$0xff]  }
 0x1fc   :  { %2306 = vmatprep.subr.bf16.mxu0 %v3705_v15  ;;  %2388 = vmatprep.subr.bf16.mxu1 %v3708_v16  ;;  %v3781_v15 = vld [vmem:[#allocation6 + $0x660] ss:$16 sps:$4 sm:$0xff]   ;;  %v3784_v16 = vld [vmem:[#allocation6 + $0x268] ss:$16 sps:$4 sm:$0xff]  }
 0x1ff   :  { %2307 = vmatpush1.bf16.msra.mxu0 %v3703_v17  ;;  %2389 = vmatpush1.bf16.msra.mxu1 %v3706_v20  ;;  %v3789_v17 = vld [vmem:[#allocation6 + $0x684] ss:$16 sps:$4 sm:$0xff]   ;;  %v3787_v20 = vld [vmem:[#allocation6 + $0x680] ss:$16 sps:$4 sm:$0xff]  }
 0x200   :  { %2308 = vmatprep.subr.bf16.mxu0 %v3711_v21  ;;  %2390 = vmatprep.subr.bf16.mxu1 %v3714_v22  ;;  %v3790_v21 = vld [vmem:[#allocation6 + $0x288] ss:$16 sps:$4 sm:$0xff]   ;;  %v3795_v22 = vld [vmem:[#allocation6 + $0x6a4] ss:$16 sps:$4 sm:$0xff]  }
 0x203   :  { %2309 = vmatpush1.bf16.msra.mxu0 %v3709_v26  ;;  %2391 = vmatpush1.bf16.msra.mxu1 %v3712_v28  ;;  %v3798_v26 = vld [vmem:[#allocation6 + $0x2ac] ss:$16 sps:$4 sm:$0xff]   ;;  %v3793_v28 = vld [vmem:[#allocation6 + $0x6a0] ss:$16 sps:$4 sm:$0xff]  }
 0x204   :  { %2310 = vmatprep.subr.bf16.mxu0 %v3717_v30  ;;  %2392 = vmatprep.subr.bf16.mxu1 %v3720_v0  ;;  %v3796_v30 = vld [vmem:[#allocation6 + $0x2a8] ss:$16 sps:$4 sm:$0xff]   ;;  %v3801_v0 = vld [vmem:[#allocation6 + $0x6c4] ss:$16 sps:$4 sm:$0xff]  }
 0x207   :  { %2311 = vmatpush1.bf16.msra.mxu0 %v3715_v32  ;;  %2393 = vmatpush1.bf16.msra.mxu1 %v3718_v33  ;;  %v3804_v32 = vld [vmem:[#allocation6 + $0x2cc] ss:$16 sps:$4 sm:$0xff]   ;;  %v3799_v33 = vld [vmem:[#allocation6 + $0x6c0] ss:$16 sps:$4 sm:$0xff]  }
 0x208   :  { %2312 = vmatprep.subr.bf16.mxu0 %v3723_v6  ;;  %2394 = vmatprep.subr.bf16.mxu1 %v3726_v34  ;;  %v3802_v6 = vld [vmem:[#allocation6 + $0x2c8] ss:$16 sps:$4 sm:$0xff]   ;;  %v3807_v34 = vld [vmem:[#allocation6 + $0x6e4] ss:$16 sps:$4 sm:$0xff]  }
 0x20b   :  { %2313 = vmatpush1.bf16.msra.mxu0 %v3721_v60  ;;  %2395 = vmatpush1.bf16.msra.mxu1 %v3724_v37  ;;  %v3810_v60 = vld [vmem:[#allocation6 + $0x2ec] ss:$16 sps:$4 sm:$0xff]   ;;  %v3805_v37 = vld [vmem:[#allocation6 + $0x6e0] ss:$16 sps:$4 sm:$0xff]  }
 0x20c   :  { %2314 = vmatprep.subr.bf16.mxu0 %v3729_v63  ;;  %2396 = vmatprep.subr.bf16.mxu1 %v3732_v38  ;;  %v3808_v63 = vld [vmem:[#allocation6 + $0x2e8] ss:$16 sps:$4 sm:$0xff]   ;;  %v3813_v38 = vld [vmem:[#allocation6 + $0x704] ss:$16 sps:$4 sm:$0xff]  }
 0x20f   :  { %2315 = vmatpush1.bf16.msra.mxu0 %v3727_v18  ;;  %2397 = vmatpush1.bf16.msra.mxu1 %v3730_v41  ;;  %v3816_v18 = vld [vmem:[#allocation6 + $0x30c] ss:$16 sps:$4 sm:$0xff]   ;;  %v3811_v41 = vld [vmem:[#allocation6 + $0x700] ss:$16 sps:$4 sm:$0xff]  }
 0x210   :  { %2316 = vmatprep.subr.bf16.mxu0 %v3735_v23  ;;  %2398 = vmatprep.subr.bf16.mxu1 %v3738_v42  ;;  %v3814_v23 = vld [vmem:[#allocation6 + $0x308] ss:$16 sps:$4 sm:$0xff]   ;;  %v3819_v42 = vld [vmem:[#allocation6 + $0x724] ss:$16 sps:$4 sm:$0xff]  }
 0x213   :  { %2317 = vmatpush1.bf16.msra.mxu0 %v3733_v43  ;;  %2399 = vmatpush1.bf16.msra.mxu1 %v3736_v44  ;;  %v3822_v43 = vld [vmem:[#allocation6 + $0x32c] ss:$16 sps:$4 sm:$0xff]   ;;  %v3817_v44 = vld [vmem:[#allocation6 + $0x720] ss:$16 sps:$4 sm:$0xff]  }
 0x214   :  { %2318 = vmatprep.subr.bf16.mxu0 %v3741_v45  ;;  %2400 = vmatprep.subr.bf16.mxu1 %v3744_v47  ;;  %v3820_v45 = vld [vmem:[#allocation6 + $0x328] ss:$16 sps:$4 sm:$0xff]   ;;  %v3825_v47 = vld [vmem:[#allocation6 + $0x744] ss:$16 sps:$4 sm:$0xff]  }
 0x217   :  { %2319 = vmatpush1.bf16.msra.mxu0 %v3739_v48  ;;  %2401 = vmatpush1.bf16.msra.mxu1 %v3742_v29  ;;  %v3828_v48 = vld [vmem:[#allocation6 + $0x34c] ss:$16 sps:$4 sm:$0xff]   ;;  %v3823_v29 = vld [vmem:[#allocation6 + $0x740] ss:$16 sps:$4 sm:$0xff]  }
 0x218   :  { %2320 = vmatprep.subr.bf16.mxu0 %v3747_v49  ;;  %2402 = vmatprep.subr.bf16.mxu1 %v3750_v24  ;;  %v3826_v49 = vld [vmem:[#allocation6 + $0x348] ss:$16 sps:$4 sm:$0xff]   ;;  %v3831_v24 = vld [vmem:[#allocation6 + $0x764] ss:$16 sps:$4 sm:$0xff]  }
 0x21b   :  { %2321 = vmatpush1.bf16.msra.mxu0 %v3745_v46  ;;  %2403 = vmatpush1.bf16.msra.mxu1 %v3748_v50  ;;  %v3834_v46 = vld [vmem:[#allocation6 + $0x36c] ss:$16 sps:$4 sm:$0xff]   ;;  %v3829_v50 = vld [vmem:[#allocation6 + $0x760] ss:$16 sps:$4 sm:$0xff]  }
 0x21c   :  { %2322 = vmatprep.subr.bf16.mxu0 %v3753_v51  ;;  %2404 = vmatprep.subr.bf16.mxu1 %v3756_v52  ;;  %v3832_v51 = vld [vmem:[#allocation6 + $0x368] ss:$16 sps:$4 sm:$0xff]   ;;  %v3837_v52 = vld [vmem:[#allocation6 + $0x784] ss:$16 sps:$4 sm:$0xff]  }
 0x21f   :  { %2323 = vmatpush1.bf16.msra.mxu0 %v3751_v53  ;;  %2405 = vmatpush1.bf16.msra.mxu1 %v3754_v54  ;;  %v3840_v53 = vld [vmem:[#allocation6 + $0x38c] ss:$16 sps:$4 sm:$0xff]   ;;  %v3835_v54 = vld [vmem:[#allocation6 + $0x780] ss:$16 sps:$4 sm:$0xff]  }
 0x220   :  { %2324 = vmatprep.subr.bf16.mxu0 %v3759_v25  ;;  %2406 = vmatprep.subr.bf16.mxu1 %v3762_v56  ;;  %v3838_v25 = vld [vmem:[#allocation6 + $0x388] ss:$16 sps:$4 sm:$0xff]   ;;  %v3843_v56 = vld [vmem:[#allocation6 + $0x7a4] ss:$16 sps:$4 sm:$0xff]  }
 0x223   :  { %2325 = vmatpush1.bf16.msra.mxu0 %v3757_v57  ;;  %2407 = vmatpush1.bf16.msra.mxu1 %v3760_v35  ;;  %v3846_v57 = vld [vmem:[#allocation6 + $0x3ac] ss:$16 sps:$4 sm:$0xff]   ;;  %v3841_v35 = vld [vmem:[#allocation6 + $0x7a0] ss:$16 sps:$4 sm:$0xff]  }
 0x224   :  { %2335 = vmatprep.subr.bf16.mxu0 %v3765_v59  ;;  %2417 = vmatprep.subr.bf16.mxu1 %v3768_v31  ;;  %v3844_v59 = vld [vmem:[#allocation6 + $0x3a8] ss:$16 sps:$4 sm:$0xff]   ;;  %v3849_v31 = vld [vmem:[#allocation6 + $0x7c4] ss:$16 sps:$4 sm:$0xff]  }
 0x226   :  { %2327 = vmatmul.mubr.bf16.vlgmr.msra.gmra.mrb[8].mxu0 %v4446_v27  ;;  %2409 = vmatmul.mubr.bf16.vlgmr.msra.gmra.mrb[12].mxu1 %v4416_v39  ;;  %v3786_v39 = vld [vmem:[#allocation6 + $0x26c] ss:$16 sps:$4 sm:$0xff]  }
 0x227   :  { %2336 = vmatpush1.bf16.msra.mxu0 %v3763_v62  ;;  %2367 = vmatprep.mubr.bf16.mxu0 %v4450_v2  ;;  %v3852_v62 = vld [vmem:[#allocation6 + $0x3cc] ss:$16 sps:$4 sm:$0xff]  }
 0x228   :  { %2418 = vmatpush1.bf16.msra.mxu1 %v3766_v1  ;;  %2449 = vmatprep.mubr.bf16.mxu1 %v4414_v36  ;;  %v3792_v36 = vld [vmem:[#allocation6 + $0x28c] ss:$16 sps:$4 sm:$0xff]   ;;  %v3847_v1 = vld [vmem:[#allocation6 + $0x7c0] ss:$16 sps:$4 sm:$0xff]  }
 0x229   :  { %2337 = vmatprep.subr.bf16.mxu0 %v3771_v3  ;;  %2419 = vmatprep.subr.bf16.mxu1 %v3774_v4  ;;  %v3850_v3 = vld [vmem:[#allocation6 + $0x3c8] ss:$16 sps:$4 sm:$0xff]   ;;  %v3855_v4 = vld [vmem:[#allocation6 + $0x7e4] ss:$16 sps:$4 sm:$0xff]  }
 0x22b   :  { %2338 = vmatpush1.bf16.msra.mxu0 %v3769_v10  ;;  %v3858_v10 = vld [vmem:[#allocation6 + $0x3ec] ss:$16 sps:$4 sm:$0xff]  }
 0x22c   :  { %2420 = vmatpush1.bf16.msra.mxu1 %v3772_v55  ;;  %2339 = vmatprep.subr.bf16.mxu0 %v3777_v11  ;;  %v3853_v55 = vld [vmem:[#allocation6 + $0x7e0] ss:$16 sps:$4 sm:$0xff]   ;;  %v3856_v11 = vld [vmem:[#allocation6 + $0x3e8] ss:$16 sps:$4 sm:$0xff]  }
 0x22d   :  { %2421 = vmatprep.subr.bf16.mxu1 %v3780_v12  ;;  %v3861_v12 = vld [vmem:[#allocation6 + $0x40c] ss:$16 sps:$4 sm:$0xff]  }
 0x22f   :  { %2340 = vmatpush1.bf16.msra.mxu0 %v3775_v19  ;;  %v4458_v19 = vpack.c.bf16 %v4441_v61, %v4441_v61  ;;  %v3868_v61 = vld [vmem:[#allocation6 + $0x468] ss:$16 sps:$4 sm:$0xff]  }
 0x230   :  { %2422 = vmatpush1.bf16.msra.mxu1 %v3778_v13  ;;  %2341 = vmatprep.subr.bf16.mxu0 %v3783_v14  ;;  %v3859_v13 = vld [vmem:[#allocation6 + $0x408] ss:$16 sps:$4 sm:$0xff]   ;;  %v3864_v14 = vld [vmem:[#allocation6 + $0x42c] ss:$16 sps:$4 sm:$0xff]  }
 0x231   :  { %2423 = vmatprep.subr.bf16.mxu1 %v3786_v39  ;;  %v3862_v39 = vld [vmem:[#allocation6 + $0x428] ss:$16 sps:$4 sm:$0xff]  }
 0x233   :  { %2342 = vmatpush1.bf16.msra.mxu0 %v3781_v15  ;;  %v3867_v15 = vld [vmem:[#allocation6 + $0x44c] ss:$16 sps:$4 sm:$0xff]  }
 0x234   :  { %2424 = vmatpush1.bf16.msra.mxu1 %v3784_v16  ;;  %2343 = vmatprep.subr.bf16.mxu0 %v3789_v17  ;;  %v3865_v16 = vld [vmem:[#allocation6 + $0x448] ss:$16 sps:$4 sm:$0xff]   ;;  %v3870_v17 = vld [vmem:[#allocation6 + $0x46c] ss:$16 sps:$4 sm:$0xff]  }
 0x235   :  { %2425 = vmatprep.subr.bf16.mxu1 %v3792_v36  ;;  %v3873_v36 = vld [vmem:[#allocation6 + $0x48c] ss:$16 sps:$4 sm:$0xff]  }
 0x237   :  { %2344 = vmatpush1.bf16.msra.mxu0 %v3787_v20  ;;  %v3871_v20 = vld [vmem:[#allocation6 + $0x488] ss:$16 sps:$4 sm:$0xff]  }
 0x238   :  { %2426 = vmatpush1.bf16.msra.mxu1 %v3790_v21  ;;  %2345 = vmatprep.subr.bf16.mxu0 %v3795_v22  ;;  %v3876_v21 = vld [vmem:[#allocation6 + $0x4ac] ss:$16 sps:$4 sm:$0xff]  }
 0x239   :  { %2427 = vmatprep.subr.bf16.mxu1 %v3798_v26  ;;  %v3879_v22 = vld [vmem:[#allocation6 + $0x4cc] ss:$16 sps:$4 sm:$0xff]  }
 0x23a   :  { %v3882_v26 = vld [vmem:[#allocation6 + $0x4ec] ss:$16 sps:$4 sm:$0xff]  }
 0x23b   :  { %2346 = vmatpush1.bf16.msra.mxu0 %v3793_v28  ;;  %v3880_v28 = vld [vmem:[#allocation6 + $0x4e8] ss:$16 sps:$4 sm:$0xff]  }
 0x23c   :  { %2428 = vmatpush1.bf16.msra.mxu1 %v3796_v30  ;;  %2347 = vmatprep.subr.bf16.mxu0 %v3801_v0  ;;  %v3885_v30 = vld [vmem:[#allocation6 + $0x50c] ss:$16 sps:$4 sm:$0xff]   ;;  %v3883_v0 = vld [vmem:[#allocation6 + $0x508] ss:$16 sps:$4 sm:$0xff]  }
 0x23d   :  { %2429 = vmatprep.subr.bf16.mxu1 %v3804_v32  ;;  %v3888_v32 = vld [vmem:[#allocation6 + $0x52c] ss:$16 sps:$4 sm:$0xff]  }
 0x23f   :  { %2348 = vmatpush1.bf16.msra.mxu0 %v3799_v33  ;;  %v3886_v33 = vld [vmem:[#allocation6 + $0x528] ss:$16 sps:$4 sm:$0xff]  }
 0x240   :  { %2430 = vmatpush1.bf16.msra.mxu1 %v3802_v6  ;;  %2349 = vmatprep.subr.bf16.mxu0 %v3807_v34  ;;  %v3891_v6 = vld [vmem:[#allocation6 + $0x54c] ss:$16 sps:$4 sm:$0xff]   ;;  %v3889_v34 = vld [vmem:[#allocation6 + $0x548] ss:$16 sps:$4 sm:$0xff]  }
 0x241   :  { %2431 = vmatprep.subr.bf16.mxu1 %v3810_v60  ;;  %v3894_v60 = vld [vmem:[#allocation6 + $0x56c] ss:$16 sps:$4 sm:$0xff]  }
 0x243   :  { %2350 = vmatpush1.bf16.msra.mxu0 %v3805_v37  ;;  %v3892_v37 = vld [vmem:[#allocation6 + $0x568] ss:$16 sps:$4 sm:$0xff]  }
 0x244   :  { %2432 = vmatpush1.bf16.msra.mxu1 %v3808_v63  ;;  %2351 = vmatprep.subr.bf16.mxu0 %v3813_v38  ;;  %v3897_v63 = vld [vmem:[#allocation6 + $0x58c] ss:$16 sps:$4 sm:$0xff]   ;;  %v3895_v38 = vld [vmem:[#allocation6 + $0x588] ss:$16 sps:$4 sm:$0xff]  }
 0x245   :  { %2433 = vmatprep.subr.bf16.mxu1 %v3816_v18  ;;  %v3900_v18 = vld [vmem:[#allocation6 + $0x5ac] ss:$16 sps:$4 sm:$0xff]  }
 0x247   :  { %2352 = vmatpush1.bf16.msra.mxu0 %v3811_v41  ;;  %v3898_v41 = vld [vmem:[#allocation6 + $0x5a8] ss:$16 sps:$4 sm:$0xff]  }
 0x248   :  { %2434 = vmatpush1.bf16.msra.mxu1 %v3814_v23  ;;  %2353 = vmatprep.subr.bf16.mxu0 %v3819_v42  ;;  %v3903_v23 = vld [vmem:[#allocation6 + $0x5cc] ss:$16 sps:$4 sm:$0xff]   ;;  %v3901_v42 = vld [vmem:[#allocation6 + $0x5c8] ss:$16 sps:$4 sm:$0xff]  }
 0x249   :  { %2435 = vmatprep.subr.bf16.mxu1 %v3822_v43  ;;  %v3906_v43 = vld [vmem:[#allocation6 + $0x5ec] ss:$16 sps:$4 sm:$0xff]  }
 0x24b   :  { %2354 = vmatpush1.bf16.msra.mxu0 %v3817_v44  ;;  %v3904_v44 = vld [vmem:[#allocation6 + $0x5e8] ss:$16 sps:$4 sm:$0xff]  }
 0x24c   :  { %2436 = vmatpush1.bf16.msra.mxu1 %v3820_v45  ;;  %2355 = vmatprep.subr.bf16.mxu0 %v3825_v47  ;;  %v3909_v45 = vld [vmem:[#allocation6 + $0x60c] ss:$16 sps:$4 sm:$0xff]   ;;  %v3907_v47 = vld [vmem:[#allocation6 + $0x608] ss:$16 sps:$4 sm:$0xff]  }
 0x24d   :  { %2437 = vmatprep.subr.bf16.mxu1 %v3828_v48  ;;  %v3912_v48 = vld [vmem:[#allocation6 + $0x62c] ss:$16 sps:$4 sm:$0xff]  }
 0x24f   :  { %2356 = vmatpush1.bf16.msra.mxu0 %v3823_v29  ;;  %v3910_v29 = vld [vmem:[#allocation6 + $0x628] ss:$16 sps:$4 sm:$0xff]  }
 0x250   :  { %2438 = vmatpush1.bf16.msra.mxu1 %v3826_v49  ;;  %2357 = vmatprep.subr.bf16.mxu0 %v3831_v24  ;;  %v3915_v49 = vld [vmem:[#allocation6 + $0x64c] ss:$16 sps:$4 sm:$0xff]   ;;  %v3913_v24 = vld [vmem:[#allocation6 + $0x648] ss:$16 sps:$4 sm:$0xff]  }
 0x251   :  { %2439 = vmatprep.subr.bf16.mxu1 %v3834_v46  ;;  %v3918_v46 = vld [vmem:[#allocation6 + $0x66c] ss:$16 sps:$4 sm:$0xff]  }
 0x253   :  { %2358 = vmatpush1.bf16.msra.mxu0 %v3829_v50  ;;  %v3916_v50 = vld [vmem:[#allocation6 + $0x668] ss:$16 sps:$4 sm:$0xff]  }
 0x254   :  { %2440 = vmatpush1.bf16.msra.mxu1 %v3832_v51  ;;  %2359 = vmatprep.subr.bf16.mxu0 %v3837_v52  ;;  %v3921_v51 = vld [vmem:[#allocation6 + $0x68c] ss:$16 sps:$4 sm:$0xff]   ;;  %v3919_v52 = vld [vmem:[#allocation6 + $0x688] ss:$16 sps:$4 sm:$0xff]  }
 0x255   :  { %2441 = vmatprep.subr.bf16.mxu1 %v3840_v53  ;;  %v3924_v53 = vld [vmem:[#allocation6 + $0x6ac] ss:$16 sps:$4 sm:$0xff]  }
 0x257   :  { %2360 = vmatpush1.bf16.msra.mxu0 %v3835_v54 }
 0x258   :  { %2442 = vmatpush1.bf16.msra.mxu1 %v3838_v25  ;;  %2361 = vmatprep.subr.bf16.mxu0 %v3843_v56 }
 0x259   :  { %2443 = vmatprep.subr.bf16.mxu1 %v3846_v57 }
 0x25b   :  { %2362 = vmatpush1.bf16.msra.mxu0 %v3841_v35  ;;  %v3925_v35 = vld [vmem:[#allocation6 + $0x6c8] ss:$16 sps:$4 sm:$0xff]  }
 0x25c   :  { %2444 = vmatpush1.bf16.msra.mxu1 %v3844_v59  ;;  %2363 = vmatprep.subr.bf16.mxu0 %v3849_v31  ;;  %v3930_v59 = vld [vmem:[#allocation6 + $0x6ec] ss:$16 sps:$4 sm:$0xff]   ;;  %v3928_v31 = vld [vmem:[#allocation6 + $0x6e8] ss:$16 sps:$4 sm:$0xff]  }
 0x25d   :  { %2445 = vmatprep.subr.bf16.mxu1 %v3852_v62  ;;  %v3933_v62 = vld [vmem:[#allocation6 + $0x70c] ss:$16 sps:$4 sm:$0xff]  }
 0x25f   :  { %2364 = vmatpush1.bf16.msra.mxu0 %v3847_v1  ;;  %v3931_v1 = vld [vmem:[#allocation6 + $0x708] ss:$16 sps:$4 sm:$0xff]  }
 0x260   :  { %2446 = vmatpush1.bf16.msra.mxu1 %v3850_v3  ;;  %2365 = vmatprep.subr.bf16.mxu0 %v3855_v4  ;;  %v3936_v3 = vld [vmem:[#allocation6 + $0x72c] ss:$16 sps:$4 sm:$0xff]   ;;  %v3934_v4 = vld [vmem:[#allocation6 + $0x728] ss:$16 sps:$4 sm:$0xff]  }
 0x261   :  { %2447 = vmatprep.subr.bf16.mxu1 %v3858_v10  ;;  %v3939_v10 = vld [vmem:[#allocation6 + $0x74c] ss:$16 sps:$4 sm:$0xff]  }
 0x263   :  { %2366 = vmatpush1.bf16.msra.mxu0 %v3853_v55  ;;  %v3937_v55 = vld [vmem:[#allocation6 + $0x748] ss:$16 sps:$4 sm:$0xff]  }
 0x264   :  { %2448 = vmatpush1.bf16.msra.mxu1 %v3856_v11  ;;  %v3942_v11 = vld [vmem:[#allocation6 + $0x76c] ss:$16 sps:$4 sm:$0xff]  }
 0x265   :  { %2458 = vmatprep.subr.bf16.mxu1 %v3861_v12  ;;  %v3940_v12 = vld [vmem:[#allocation6 + $0x768] ss:$16 sps:$4 sm:$0xff]  }
 0x266   :  { %2368 = vmatmul.mubr.bf16.vlgmr.msra.gmra.mrb[8].mxu0 %v4458_v19 }
 0x267   :  { %2450 = vmatmul.mubr.bf16.vlgmr.msra.gmra.mrb[12].mxu1 %v4418_v40  ;;  %v3874_v40 = vld [vmem:[#allocation6 + $0x4a8] ss:$16 sps:$4 sm:$0xff]  }
 0x268   :  { %2459 = vmatpush1.bf16.msra.mxu1 %v3859_v13  ;;  %2490 = vmatprep.mubr.bf16.mxu1 %v4437_v58  ;;  %v3877_v58 = vld [vmem:[#allocation6 + $0x4c8] ss:$16 sps:$4 sm:$0xff]   ;;  %v3945_v13 = vld [vmem:[#allocation6 + $0x78c] ss:$16 sps:$4 sm:$0xff]  }
 0x269   :  { %2460 = vmatprep.subr.bf16.mxu1 %v3864_v14  ;;  %v3943_v14 = vld [vmem:[#allocation6 + $0x788] ss:$16 sps:$4 sm:$0xff]  }
 0x26c   :  { %2461 = vmatpush1.bf16.msra.mxu1 %v3862_v39  ;;  %v3948_v39 = vld [vmem:[#allocation6 + $0x7ac] ss:$16 sps:$4 sm:$0xff]  }
 0x26d   :  { %2462 = vmatprep.subr.bf16.mxu1 %v3867_v15  ;;  %v3946_v15 = vld [vmem:[#allocation6 + $0x7a8] ss:$16 sps:$4 sm:$0xff]  }
 0x270   :  { %2463 = vmatpush1.bf16.msra.mxu1 %v3865_v16  ;;  %v3951_v16 = vld [vmem:[#allocation6 + $0x7cc] ss:$16 sps:$4 sm:$0xff]  }
 0x271   :  { %2464 = vmatprep.subr.bf16.mxu1 %v3870_v17  ;;  %v3949_v17 = vld [vmem:[#allocation6 + $0x7c8] ss:$16 sps:$4 sm:$0xff]  }
 0x274   :  { %2465 = vmatpush1.bf16.msra.mxu1 %v3868_v61  ;;  %v3954_v61 = vld [vmem:[#allocation6 + $0x7ec] ss:$16 sps:$4 sm:$0xff]  }
 0x275   :  { %2466 = vmatprep.subr.bf16.mxu1 %v3873_v36  ;;  %v3952_v36 = vld [vmem:[#allocation6 + $0x7e8] ss:$16 sps:$4 sm:$0xff]  }
 0x278   :  { %2467 = vmatpush1.bf16.msra.mxu1 %v3871_v20  ;;  %v910_v20 = vld [vmem:[%s4546_s6] sm:$0xf] }
 0x279   :  { %2468 = vmatprep.subr.bf16.mxu1 %v3876_v21  ;;  %v915_v21 = vrot.slane %v910_v20, %v4311_v5 }
 0x27c   :  { %2469 = vmatpush1.bf16.msra.mxu1 %v3874_v40  ;;  %v919_v40 = vrot.slane %v910_v20, %v4318_v8 }
 0x27d   :  { %2470 = vmatprep.subr.bf16.mxu1 %v3879_v22 }
 0x280   :  { %2471 = vmatpush1.bf16.msra.mxu1 %v3877_v58 }
 0x281   :  { %2472 = vmatprep.subr.bf16.mxu1 %v3882_v26 }
 0x284   :  { %2473 = vmatpush1.bf16.msra.mxu1 %v3880_v28 }
 0x285   :  { %2474 = vmatprep.subr.bf16.mxu1 %v3885_v30 }
 0x288   :  { %2475 = vmatpush1.bf16.msra.mxu1 %v3883_v0 }
 0x289   :  { %2476 = vmatprep.subr.bf16.mxu1 %v3888_v32 }
 0x28c   :  { %2477 = vmatpush1.bf16.msra.mxu1 %v3886_v33 }
 0x28d   :  { %2478 = vmatprep.subr.bf16.mxu1 %v3891_v6  ;;  %v3955_v6 = vld [vmem:[#allocation8] ss:$8 sps:$4 sm:$0xff]  }
 0x290   :  { %2479 = vmatpush1.bf16.msra.mxu1 %v3889_v34  ;;  %v3957_v34 = vld [vmem:[#allocation8 + $0x4] ss:$8 sps:$4 sm:$0xff]  }
 0x291   :  { %2480 = vmatprep.subr.bf16.mxu1 %v3894_v60  ;;  %v3960_v60 = vld [vmem:[#allocation8 + $0x14] ss:$8 sps:$4 sm:$0xff]   ;;  %3041 = vmatprep.subr.bf16.mxu0 %v3957_v34  ;;  %v3994_v34 = vld [vmem:[#allocation8 + $0xd0] ss:$8 sps:$4 sm:$0xff]  }
 0x292   :  { %3042 = vmatpush1.bf16.msra.mxu0 %v3955_v6  ;;  %v3996_v6 = vld [vmem:[#allocation8 + $0xd4] ss:$8 sps:$4 sm:$0xff]  }
 0x293   :  { %3043 = vmatprep.subr.bf16.mxu0 %v3960_v60  ;;  %v3999_v60 = vld [vmem:[#allocation8 + $0xe4] ss:$8 sps:$4 sm:$0xff]  }
 0x294   :  { %2481 = vmatpush1.bf16.msra.mxu1 %v3892_v37  ;;  %v3963_v37 = vld [vmem:[#allocation8 + $0x24] ss:$8 sps:$4 sm:$0xff]  }
 0x295   :  { %2482 = vmatprep.subr.bf16.mxu1 %v3897_v63  ;;  %v3961_v63 = vld [vmem:[#allocation8 + $0x20] ss:$8 sps:$4 sm:$0xff]  }
 0x298   :  { %2483 = vmatpush1.bf16.msra.mxu1 %v3895_v38  ;;  %v3966_v38 = vld [vmem:[#allocation8 + $0x34] ss:$8 sps:$4 sm:$0xff]  }
 0x299   :  { %2484 = vmatprep.subr.bf16.mxu1 %v3900_v18  ;;  %v3964_v18 = vld [vmem:[#allocation8 + $0x30] ss:$8 sps:$4 sm:$0xff]  }
 0x29c   :  { %2485 = vmatpush1.bf16.msra.mxu1 %v3898_v41  ;;  %v3969_v41 = vld [vmem:[#allocation8 + $0x44] ss:$8 sps:$4 sm:$0xff]  }
 0x29d   :  { %2486 = vmatprep.subr.bf16.mxu1 %v3903_v23  ;;  %v3967_v23 = vld [vmem:[#allocation8 + $0x40] ss:$8 sps:$4 sm:$0xff]  }
 0x2a0   :  { %2487 = vmatpush1.bf16.msra.mxu1 %v3901_v42  ;;  %v3972_v42 = vld [vmem:[#allocation8 + $0x54] ss:$8 sps:$4 sm:$0xff]  }
 0x2a1   :  { %2488 = vmatprep.subr.bf16.mxu1 %v3906_v43  ;;  %v3970_v43 = vld [vmem:[#allocation8 + $0x50] ss:$8 sps:$4 sm:$0xff]  }
 0x2a4   :  { %2489 = vmatpush1.bf16.msra.mxu1 %v3904_v44  ;;  %v3975_v44 = vld [vmem:[#allocation8 + $0x64] ss:$8 sps:$4 sm:$0xff]  }
 0x2a5   :  { %2499 = vmatprep.subr.bf16.mxu1 %v3909_v45  ;;  %v3973_v45 = vld [vmem:[#allocation8 + $0x60] ss:$8 sps:$4 sm:$0xff]  }
 0x2a7   :  { %2491 = vmatmul.mubr.bf16.vlgmr.msra.gmra.mrb[12].mxu1 %v4446_v27  ;;  %v3922_v27 = vld [vmem:[#allocation6 + $0x6a8] ss:$16 sps:$4 sm:$0xff]  }
 0x2a8   :  { %2500 = vmatpush1.bf16.msra.mxu1 %v3907_v47  ;;  %2531 = vmatprep.mubr.bf16.mxu1 %v4450_v2  ;;  %v3927_v2 = vld [vmem:[#allocation6 + $0x6cc] ss:$16 sps:$4 sm:$0xff]  }
 0x2a9   :  { %2501 = vmatprep.subr.bf16.mxu1 %v3912_v48  ;;  %v3978_v47 = vld [vmem:[#allocation8 + $0x74] ss:$8 sps:$4 sm:$0xff]   ;;  %v3976_v48 = vld [vmem:[#allocation8 + $0x70] ss:$8 sps:$4 sm:$0xff]  }
 0x2ac   :  { %2502 = vmatpush1.bf16.msra.mxu1 %v3910_v29  ;;  %v3981_v29 = vld [vmem:[#allocation8 + $0x84] ss:$8 sps:$4 sm:$0xff]  }
 0x2ad   :  { %2503 = vmatprep.subr.bf16.mxu1 %v3915_v49  ;;  %v3979_v49 = vld [vmem:[#allocation8 + $0x80] ss:$8 sps:$4 sm:$0xff]  }
 0x2b0   :  { %2504 = vmatpush1.bf16.msra.mxu1 %v3913_v24 }
 0x2b1   :  { %2505 = vmatprep.subr.bf16.mxu1 %v3918_v46 }
 0x2b4   :  { %2506 = vmatpush1.bf16.msra.mxu1 %v3916_v50  ;;  %v923_v50 = vrot.slane %v910_v20, %v4316_v7 }
 0x2b5   :  { %2507 = vmatprep.subr.bf16.mxu1 %v3921_v51  ;;  %v927_v51 = vrot.slane %v910_v20, %v4320_v9 }
 0x2b8   :  { %2508 = vmatpush1.bf16.msra.mxu1 %v3919_v52 }
 0x2b9   :  { %v2246_v54 = vpop.f32.mrb[8].mxu1  ;;  %2509 = vmatprep.subr.bf16.mxu1 %v3924_v53 }
 0x2ba   :  { %v2248_v25 = vpop.f32.mrb[9].mxu1  ;;  %v2247_v22 = vadd.f32 %v2246_v54, %v915_v21 }
 0x2bb   :  { %v2250_v56 = vpop.f32.mrb[10].mxu1  ;;  %v2249_v58 = vadd.f32 %v2248_v25, %v919_v40 }
 0x2bc   :  { %2510 = vmatpush1.bf16.msra.mxu1 %v3922_v27  ;;  %v2251_v57 = vpop.f32.mrb[11].mxu1 }
 0x2bd   :  { %2511 = vmatprep.subr.bf16.mxu1 %v3927_v2 }
 0x2c0   :  { %2512 = vmatpush1.bf16.msra.mxu1 %v3925_v35 }
 0x2c1   :  { %2513 = vmatprep.subr.bf16.mxu1 %v3930_v59 }
 0x2c4   :  { %2514 = vmatpush1.bf16.msra.mxu1 %v3928_v31 }
 0x2c5   :  { %2515 = vmatprep.subr.bf16.mxu1 %v3933_v62 }
 0x2c8   :  { %2516 = vmatpush1.bf16.msra.mxu1 %v3931_v1 }
 0x2c9   :  { %2517 = vmatprep.subr.bf16.mxu1 %v3936_v3 }
 0x2cc   :  { %2518 = vmatpush1.bf16.msra.mxu1 %v3934_v4 }
 0x2cd   :  { %2519 = vmatprep.subr.bf16.mxu1 %v3939_v10 }
 0x2d0   :  { %2520 = vmatpush1.bf16.msra.mxu1 %v3937_v55 }
 0x2d1   :  { %2521 = vmatprep.subr.bf16.mxu1 %v3942_v11 }
 0x2d4   :  { %2522 = vmatpush1.bf16.msra.mxu1 %v3940_v12 }
 0x2d5   :  { %2523 = vmatprep.subr.bf16.mxu1 %v3945_v13 }
 0x2d8   :  { %2524 = vmatpush1.bf16.msra.mxu1 %v3943_v14 }
 0x2d9   :  { %2525 = vmatprep.subr.bf16.mxu1 %v3948_v39 }
 0x2dc   :  { %2526 = vmatpush1.bf16.msra.mxu1 %v3946_v15 }
 0x2dd   :  { %2527 = vmatprep.subr.bf16.mxu1 %v3951_v16 }
 0x2e0   :  { %2528 = vmatpush1.bf16.msra.mxu1 %v3949_v17 }
 0x2e1   :  { %2529 = vmatprep.subr.bf16.mxu1 %v3954_v61 }
 0x2e4   :  { %2530 = vmatpush1.bf16.msra.mxu1 %v3952_v36 }
 0x2e7   :  { %2532 = vmatmul.mubr.bf16.vlgmr.msra.gmra.mrb[12].mxu1 %v4458_v19  ;;  %v3958_v19 = vld [vmem:[#allocation8 + $0x10] ss:$8 sps:$4 sm:$0xff]  }
 0x2e8   :  { %3044 = vmatpush1.bf16.msra.mxu0 %v3958_v19  ;;  %v3997_v19 = vld [vmem:[#allocation8 + $0xe0] ss:$8 sps:$4 sm:$0xff]  }
 0x2e9   :  { %3045 = vmatprep.subr.bf16.mxu0 %v3963_v37  ;;  %v4002_v37 = vld [vmem:[#allocation8 + $0xf4] ss:$8 sps:$4 sm:$0xff]  }
 0x2ec   :  { %3046 = vmatpush1.bf16.msra.mxu0 %v3961_v63  ;;  %v4000_v63 = vld [vmem:[#allocation8 + $0xf0] ss:$8 sps:$4 sm:$0xff]  }
 0x2ed   :  { %3047 = vmatprep.subr.bf16.mxu0 %v3966_v38  ;;  %v4005_v38 = vld [vmem:[#allocation8 + $0x104] ss:$8 sps:$4 sm:$0xff]  }
 0x2f0   :  { %3048 = vmatpush1.bf16.msra.mxu0 %v3964_v18 }
 0x2f1   :  { %3049 = vmatprep.subr.bf16.mxu0 %v3969_v41 }
 0x2f4   :  { %3050 = vmatpush1.bf16.msra.mxu0 %v3967_v23 }
 0x2f5   :  { %3051 = vmatprep.subr.bf16.mxu0 %v3972_v42 }
 0x2f8   :  { %3052 = vmatpush1.bf16.msra.mxu0 %v3970_v43 }
 0x2f9   :  { %3053 = vmatprep.subr.bf16.mxu0 %v3975_v44 }
 0x2fc   :  { %3054 = vmatpush1.bf16.msra.mxu0 %v3973_v45 }
 0x2fd   :  { %3055 = vmatprep.subr.bf16.mxu0 %v3978_v47 }
 0x300   :  { %3056 = vmatpush1.bf16.msra.mxu0 %v3976_v48  ;;  %v2556_v48 = vld [vmem:[%s4547_s7] sm:$0xf] }
 0x301   :  { %3057 = vmatprep.subr.bf16.mxu0 %v3981_v29  ;;  %v2557_v29 = vld [vmem:[%s4548_s8] sm:$0xf] }
 0x304   :  { %3058 = vmatpush1.bf16.msra.mxu0 %v3979_v49  ;;  %v2587_v49 = vrot.slane %v2556_v48, %v4318_v8 }
 0x339   :  { %v2369_v26 = vpop.f32.mrb[8].mxu0 }
 0x33a   :  { %v3527_v28 = vadd.f32 %v2369_v26, %v2247_v22  ;;  %v2371_v30 = vpop.f32.mrb[9].mxu0  ;;  %v3984_v22 = vld [vmem:[#allocation8 + $0x94] ss:$8 sps:$4 sm:$0xff]   ;;  %v3987_v26 = vld [vmem:[#allocation8 + $0xa4] ss:$8 sps:$4 sm:$0xff]  }
 0x33b   :  { %v3529_v0 = vadd.f32 %v2371_v30, %v2249_v58  ;;  %v2373_v32 = vpop.f32.mrb[10].mxu0  ;;  %v3982_v58 = vld [vmem:[#allocation8 + $0x90] ss:$8 sps:$4 sm:$0xff]   ;;  %3059 = vmatprep.subr.bf16.mxu0 %v3984_v22  ;;  %v3990_v30 = vld [vmem:[#allocation8 + $0xb4] ss:$8 sps:$4 sm:$0xff]  }
 0x33c   :  { %v2374_v33 = vpop.f32.mrb[11].mxu0  ;;  %v2540_v24 = vmul.f32 0.5, %v3527_v28  ;;  %3060 = vmatpush1.bf16.msra.mxu0 %v3982_v58  ;;  %v3985_v28 = vld [vmem:[#allocation8 + $0xa0] ss:$8 sps:$4 sm:$0xff]   ;;  %v3993_v32 = vld [vmem:[#allocation8 + $0xc4] ss:$8 sps:$4 sm:$0xff]  }
 0x33d   :  { %v2541_v46 = vmul.f32 0.5, %v3529_v0  ;;  %3061 = vmatprep.subr.bf16.mxu0 %v3987_v26  ;;  %v3988_v0 = vld [vmem:[#allocation8 + $0xb0] ss:$8 sps:$4 sm:$0xff]   ;;  %v3991_v33 = vld [vmem:[#allocation8 + $0xc0] ss:$8 sps:$4 sm:$0xff]  }
 0x33e   :  { %4071 = vtanh.f32 %v2540_v24  ;;  %v4014_v22 = vld [vmem:[#allocation8 + $0x134] ss:$8 sps:$4 sm:$0xff]   ;;  %v4012_v58 = vld [vmem:[#allocation8 + $0x130] ss:$8 sps:$4 sm:$0xff]   ;;  %v4017_v26 = vld [vmem:[#allocation8 + $0x144] ss:$8 sps:$4 sm:$0xff]  }
 0x33f   :  { %4073 = vtanh.f32 %v2541_v46 }
 0x340   :  { %3062 = vmatpush1.bf16.msra.mxu0 %v3985_v28  ;;  %v4015_v28 = vld [vmem:[#allocation8 + $0x140] ss:$8 sps:$4 sm:$0xff]  }
 0x341   :  { %3063 = vmatprep.subr.bf16.mxu0 %v3990_v30  ;;  %v4020_v30 = vld [vmem:[#allocation8 + $0x154] ss:$8 sps:$4 sm:$0xff]  }
 0x344   :  { %3064 = vmatpush1.bf16.msra.mxu0 %v3988_v0  ;;  %v4018_v0 = vld [vmem:[#allocation8 + $0x150] ss:$8 sps:$4 sm:$0xff]  }
 0x345   :  { %3065 = vmatprep.subr.bf16.mxu0 %v3993_v32  ;;  %v4023_v32 = vld [vmem:[#allocation8 + $0x164] ss:$8 sps:$4 sm:$0xff]  }
 0x348   :  { %v4072_v57 = vpop.eup %4071  ;;  %3066 = vmatpush1.bf16.msra.mxu0 %v3991_v33  ;;  %v4021_v33 = vld [vmem:[#allocation8 + $0x160] ss:$8 sps:$4 sm:$0xff]  }
 0x349   :  { %v4074_v59 = vpop.eup %4073  ;;  %v2548_v31 = vadd.f32 1.0, %v4072_v57  ;;  %3067 = vmatprep.subr.bf16.mxu0 %v3996_v6  ;;  %v2624_v57 = vrot.slane %v2557_v29, %v4316_v7  ;;  %v4026_v6 = vld [vmem:[#allocation8 + $0x174] ss:$8 sps:$4 sm:$0xff]  }
 0x34a   :  { %v2549_v62 = vadd.f32 1.0, %v4074_v59 }
 0x34b   :  { %v4473_v1 = vmul.f32 %v2548_v31, %v2540_v24  ;;  %v2583_v24 = vrot.slane %v2556_v48, %v4311_v5 }
 0x34c   :  { %v4475_v3 = vmul.f32 %v2549_v62, %v2541_v46  ;;  %3068 = vmatpush1.bf16.msra.mxu0 %v3994_v34  ;;  %v2595_v46 = vrot.slane %v2556_v48, %v4320_v9  ;;  %v4024_v34 = vld [vmem:[#allocation8 + $0x170] ss:$8 sps:$4 sm:$0xff]  }
 0x34d   :  { %v2564_v11 = vmul.f32 %v4473_v1, %v4473_v1  ;;  %3069 = vmatprep.subr.bf16.mxu0 %v3999_v60  ;;  %v4029_v60 = vld [vmem:[#allocation8 + $0x184] ss:$8 sps:$4 sm:$0xff]  }
 0x34e   :  { %v2565_v12 = vmul.f32 %v4475_v3, %v4475_v3  ;;  %v2558_v39 = vadd.f32 %v4475_v3, %v4473_v1 }
 0x350   :  { %v2568_v61 = vadd.f32 %v2565_v12, %v2564_v11  ;;  %3070 = vmatpush1.bf16.msra.mxu0 %v3997_v19  ;;  %v4027_v19 = vld [vmem:[#allocation8 + $0x180] ss:$8 sps:$4 sm:$0xff]  }
 0x351   :  { %3071 = vmatprep.subr.bf16.mxu0 %v4002_v37  ;;  %v4032_v37 = vld [vmem:[#allocation8 + $0x194] ss:$8 sps:$4 sm:$0xff]  }
 0x354   :  { %3072 = vmatpush1.bf16.msra.mxu0 %v4000_v63  ;;  %v4030_v63 = vld [vmem:[#allocation8 + $0x190] ss:$8 sps:$4 sm:$0xff]  }
 0x355   :  { %3082 = vmatprep.subr.bf16.mxu0 %v4005_v38  ;;  %v4035_v38 = vld [vmem:[#allocation8 + $0x1a4] ss:$8 sps:$4 sm:$0xff]  }
 0x3ba   :  { %v2533_v52 = vpop.f32.mrb[12].mxu1 }
 0x3bb   :  { %v3530_v53 = vadd.f32 %v2533_v52, %v923_v50  ;;  %v2535_v27 = vpop.f32.mrb[13].mxu1  ;;  %v2591_v50 = vrot.slane %v2556_v48, %v4316_v7  ;;  %v2620_v52 = vrot.slane %v2557_v29, %v4318_v8  ;;  %v4045_v48 = vld [vmem:[#allocation8 + $0x1e0] ss:$8 sps:$4 sm:$0xff]  }
 0x3bc   :  { %v3531_v54 = vadd.f32 %v2535_v27, %v927_v51  ;;  %v2537_v2 = vpop.f32.mrb[14].mxu1 }
 0x3bd   :  { %v2542_v25 = vmul.f32 0.5, %v3530_v53  ;;  %v2538_v56 = vpop.f32.mrb[15].mxu1  ;;  %v2616_v53 = vrot.slane %v2557_v29, %v4311_v5 }
 0x3be   :  { %v2543_v35 = vmul.f32 0.5, %v3531_v54  ;;  %v2628_v56 = vrot.slane %v2557_v29, %v4320_v9  ;;  %v4050_v29 = vld [vmem:[#allocation8 + $0x1f4] ss:$8 sps:$4 sm:$0xff]  }
 0x3bf   :  { %4075 = vtanh.f32 %v2542_v25 }
 0x3c0   :  { %4077 = vtanh.f32 %v2543_v35 }
 0x3c9   :  { %v4076_v4 = vpop.eup %4075 }
 0x3ca   :  { %v4078_v10 = vpop.eup %4077  ;;  %v2550_v55 = vadd.f32 1.0, %v4076_v4 }
 0x3cb   :  { %v2551_v13 = vadd.f32 1.0, %v4078_v10 }
 0x3cc   :  { %v4481_v14 = vmul.f32 %v2550_v55, %v2542_v25 }
 0x3cd   :  { %v4485_v15 = vmul.f32 %v2551_v13, %v2543_v35 }
 0x3ce   :  { %v2559_v16 = vadd.f32 %v2558_v39, %v4481_v14  ;;  %v2566_v17 = vmul.f32 %v4481_v14, %v4481_v14 }
 0x3cf   :  { %v2567_v36 = vmul.f32 %v4485_v15, %v4485_v15 }
 0x3d0   :  { %v2560_v20 = vadd.f32 %v2559_v16, %v4485_v15  ;;  %v2569_v21 = vadd.f32 %v2568_v61, %v2566_v17 }
 0x3d2   :  { %2561 = vadd.xlane.f32.xlu0 %v2560_v20  ;;  %v2570_v40 = vadd.f32 %v2569_v21, %v2567_v36  ;;  %v4003_v20 = vld [vmem:[#allocation8 + $0x100] ss:$8 sps:$4 sm:$0xff]  }
 0x3d4   :  { %2571 = vadd.xlane.f32.xlu1 %v2570_v40  ;;  %v4008_v40 = vld [vmem:[#allocation8 + $0x114] ss:$8 sps:$4 sm:$0xff]  }
 0x45f   :  { %v2562_v18 = vpop.xlane.xlu0 %2561 }
 0x460   :  { %v2563_v41 = vmul.f32 0.001953125, %v2562_v18  ;;  %v4033_v18 = vld [vmem:[#allocation8 + $0x1a0] ss:$8 sps:$4 sm:$0xff]  }
 0x461   :  { %v2572_v23 = vpop.xlane.xlu1 %2571 }
 0x462   :  { %v2573_v42 = vmul.f32 0.001953125, %v2572_v23  ;;  %v2574_v43 = vmul.f32 %v2563_v41, %v2563_v41  ;;  %v4036_v23 = vld [vmem:[#allocation8 + $0x1b0] ss:$8 sps:$4 sm:$0xff]  }
 0x464   :  { %v2575_v44 = vsub.f32 %v2573_v42, %v2574_v43  ;;  %v4041_v42 = vld [vmem:[#allocation8 + $0x1c4] ss:$8 sps:$4 sm:$0xff]   ;;  %v4039_v43 = vld [vmem:[#allocation8 + $0x1c0] ss:$8 sps:$4 sm:$0xff]  }
 0x466   :  { %v2576_v45 = vmax.f32 %v2575_v44, 0.0  ;;  %v4044_v44 = vld [vmem:[#allocation8 + $0x1d4] ss:$8 sps:$4 sm:$0xff]  }
 0x468   :  { %v2577_v47 = vadd.f32 1e-05, %v2576_v45  ;;  %v4042_v45 = vld [vmem:[#allocation8 + $0x1d0] ss:$8 sps:$4 sm:$0xff]  }
 0x46a   :  { %4079 = vrsqrt.f32 %v2577_v47  ;;  %v4047_v47 = vld [vmem:[#allocation8 + $0x1e4] ss:$8 sps:$4 sm:$0xff]  }
 0x474   :  { %v4080_v51 = vpop.eup %4079 }
 0x475   :  { %v2601_v27 = vmul.f32 %v4080_v51, %v2587_v49  ;;  %v2600_v54 = vmul.f32 %v4080_v51, %v2583_v24  ;;  %v2603_v2 = vmul.f32 %v4080_v51, %v2595_v46  ;;  %v2602_v25 = vmul.f32 %v4080_v51, %v2591_v50  ;;  %v4048_v49 = vld [vmem:[#allocation8 + $0x1f0] ss:$8 sps:$4 sm:$0xff]   ;;  %v2709_v46 = vld [vmem:[%s4550_s10] sm:$0x3]  ;;  %s4189_s10 = smov [#allocation9]  }
 0x476   :  { %v2714_v50 = vrot.slane %v2709_v46, %v4311_v5  ;;  %v2718_v51 = vrot.slane %v2709_v46, %v4318_v8 }
 0x477   :  { %v2609_v35 = vmul.f32 %v2601_v27, %v2563_v41  ;;  %v2608_v59 = vmul.f32 %v2600_v54, %v2563_v41  ;;  %v2611_v31 = vmul.f32 %v2603_v2, %v2563_v41  ;;  %v2610_v62 = vmul.f32 %v2602_v25, %v2563_v41  ;;  %v4038_v41 = vld [vmem:[#allocation8 + $0x1b4] ss:$8 sps:$4 sm:$0xff]  }
 0x478   :  { %v2605_v4 = vmul.f32 %v2601_v27, %v4475_v3  ;;  %v2604_v55 = vmul.f32 %v2600_v54, %v4473_v1  ;;  %v2607_v12 = vmul.f32 %v2603_v2, %v4485_v15  ;;  %v2606_v39 = vmul.f32 %v2602_v25, %v4481_v14  ;;  %v4006_v1 = vld [vmem:[#allocation8 + $0x110] ss:$8 sps:$4 sm:$0xff]   ;;  %v4011_v15 = vld [vmem:[#allocation8 + $0x124] ss:$8 sps:$4 sm:$0xff]   ;;  %v4009_v14 = vld [vmem:[#allocation8 + $0x120] ss:$8 sps:$4 sm:$0xff]  }
 0x479   :  { %v2634_v10 = vsub.f32 %v2620_v52, %v2609_v35  ;;  %v2633_v11 = vsub.f32 %v2616_v53, %v2608_v59  ;;  %v2636_v13 = vsub.f32 %v2628_v56, %v2611_v31  ;;  %v2635_v16 = vsub.f32 %v2624_v57, %v2610_v62  ;;  %v3133_v35 = vld [vmem:[%s4551_s11] sm:$0x3]  ;;  %s3173_s11 = sshll.u32 %s4189_s10, 4  ;;  %s3174_s11 = int_to_ptr.vmem [resolvable:$true] %s3173_s11 }
 0x47a   :  { %s4151_s30 = scalar_lea.vmem %s3174_s11, 256  ;;  %p4156_p11 = scmp.lt.s32.totalorder %s3174_s11, %s3174_s11 }
 0x47b   :  { %v2638_v17 = vadd.f32 %v2634_v10, %v2605_v4  ;;  %v2637_v9 = vadd.f32 %v2633_v11, %v2604_v55  ;;  %v2640_v61 = vadd.f32 %v2636_v13, %v2607_v12  ;;  %v4511_v7 = vadd.f32 %v2635_v16, %v2606_v39  ;;  %p4152_p10 = scmp.ne.s32.totalorder %s3174_s11, %s4151_s30  ;;  %p4157_p12 = scmp.lt.s32.totalorder %s4151_s30, %s4151_s30 }
 0x47c   :  { %v3138_v4 = vrot.slane %v3133_v35, %v4311_v5  ;;  %v3142_v55 = vrot.slane %v3133_v35, %v4318_v8 }
 0x47d   :  { %v2642_v36 = vpack.c.bf16 %v2638_v17, %v2638_v17  ;;  %v2641_v21 = vpack.c.bf16 %v2637_v9, %v2637_v9  ;;  %v2644_v3 = vpack.c.bf16 %v2640_v61, %v2640_v61  ;;  %v2643_v24 = vpack.c.bf16 %v4511_v7, %v4511_v7  ;;  %v3525_v17 = vld [vmem:[#allocation2] ss:$0 sm:$0xff]  ;;  %p4158_p13 = por %p4157_p12, %p4156_p11 }
 0x47f   :  { %3073 = vmatprep.mubr.bf16.mxu0 %v2642_v36  ;;  %p4159_p0 = pnand %p4158_p13, %p4152_p10 }
 0x480   :  { %3074 = vmatmul.mubr.bf16.vlgmr.msra.gmra.mrb[12].mxu0 %v2641_v21 }
 0x481   :  { %3083 = vmatpush1.bf16.msra.mxu0 %v4003_v20  ;;  %3114 = vmatprep.mubr.bf16.mxu0 %v2644_v3 }
 0x482   :  { %3084 = vmatprep.subr.bf16.mxu0 %v4008_v40 }
 0x485   :  { %3085 = vmatpush1.bf16.msra.mxu0 %v4006_v1 }
 0x486   :  { %3086 = vmatprep.subr.bf16.mxu0 %v4011_v15 }
 0x489   :  { %3087 = vmatpush1.bf16.msra.mxu0 %v4009_v14 }
 0x48a   :  { %3088 = vmatprep.subr.bf16.mxu0 %v4014_v22 }
 0x48d   :  { %3089 = vmatpush1.bf16.msra.mxu0 %v4012_v58 }
 0x48e   :  { %3090 = vmatprep.subr.bf16.mxu0 %v4017_v26 }
 0x491   :  { %3091 = vmatpush1.bf16.msra.mxu0 %v4015_v28 }
 0x492   :  { %3092 = vmatprep.subr.bf16.mxu0 %v4020_v30 }
 0x495   :  { %3093 = vmatpush1.bf16.msra.mxu0 %v4018_v0 }
 0x496   :  { %3094 = vmatprep.subr.bf16.mxu0 %v4023_v32 }
 0x499   :  { %3095 = vmatpush1.bf16.msra.mxu0 %v4021_v33 }
 0x49a   :  { %3096 = vmatprep.subr.bf16.mxu0 %v4026_v6 }
 0x49d   :  { %3097 = vmatpush1.bf16.msra.mxu0 %v4024_v34 }
 0x49e   :  { %3098 = vmatprep.subr.bf16.mxu0 %v4029_v60 }
 0x4a1   :  { %3099 = vmatpush1.bf16.msra.mxu0 %v4027_v19 }
 0x4a2   :  { %3100 = vmatprep.subr.bf16.mxu0 %v4032_v37 }
 0x4a5   :  { %3101 = vmatpush1.bf16.msra.mxu0 %v4030_v63 }
 0x4a6   :  { %3102 = vmatprep.subr.bf16.mxu0 %v4035_v38 }
 0x4a9   :  { %3103 = vmatpush1.bf16.msra.mxu0 %v4033_v18 }
 0x4aa   :  { %3104 = vmatprep.subr.bf16.mxu0 %v4038_v41 }
 0x4ad   :  { %3105 = vmatpush1.bf16.msra.mxu0 %v4036_v23 }
 0x4ae   :  { %3106 = vmatprep.subr.bf16.mxu0 %v4041_v42 }
 0x4b1   :  { %3107 = vmatpush1.bf16.msra.mxu0 %v4039_v43 }
 0x4b2   :  { %3108 = vmatprep.subr.bf16.mxu0 %v4044_v44 }
 0x4b5   :  { %3109 = vmatpush1.bf16.msra.mxu0 %v4042_v45 }
 0x4b6   :  { %3110 = vmatprep.subr.bf16.mxu0 %v4047_v47 }
 0x4b9   :  { %3111 = vmatpush1.bf16.msra.mxu0 %v4045_v48 }
 0x4ba   :  { %3112 = vmatprep.subr.bf16.mxu0 %v4050_v29 }
 0x4bd   :  { %3113 = vmatpush1.bf16.msra.mxu0 %v4048_v49 }
 0x4c0   :  { %3115 = vmatmul.mubr.bf16.vlgmr.msra.gmra.mrb[12].mxu0 %v2643_v24 }
 0x593   :  { %v3116_v52 = vpop.f32.mrb[12].mxu0 }
 0x594   :  { %v3532_v53 = vadd.f32 %v3116_v52, %v2714_v50  ;;  %v3118_v27 = vpop.f32.mrb[13].mxu0 }
 0x595   :  { %v3533_v54 = vadd.f32 %v3118_v27, %v2718_v51  ;;  %v3120_v2 = vpop.f32.mrb[14].mxu0 }
 0x596   :  { %3123 = vst [vmem:[#allocation9] sm:$0xff] %v3532_v53  ;;  %v3125_v25 = vmul.f32 0.5, %v3532_v53  ;;  %v3121_v56 = vpop.f32.mrb[15].mxu0 }
 0x597   :  { %3124 = vst [vmem:[#allocation9 + $0x8] sm:$0xff] %v3533_v54  ;;  %v3126_v57 = vmul.f32 0.5, %v3533_v54 }
 0x598   :  { %4081 = vtanh.f32 %v3125_v25 }
 0x599   :  { %4083 = vtanh.f32 %v3126_v57 }
 0x5a2   :  { %v4082_v59 = vpop.eup %4081 }
 0x5a3   :  { %v4084_v31 = vpop.eup %4083  ;;  %v3129_v62 = vadd.f32 1.0, %v4082_v59 }
 0x5a4   :  { %v3130_v10 = vadd.f32 1.0, %v4084_v31 }
 0x5a5   :  { %v3131_v11 = vmul.f32 %v3129_v62, %v3125_v25 }
 0x5a6   :  { %v3132_v12 = vmul.f32 %v3130_v10, %v3126_v57 }
 0x5a7   :  { %v3145_v13 = vmul.f32 %v3138_v4, %v3131_v11 }
 0x5a8   :  { %v3146_v39 = vmul.f32 %v3142_v55, %v3132_v12 }
 0x5aa   :  { %v3147_v16 = vadd.f32 %v3146_v39, %v3145_v13 }
 0x5ac   :  { %3148 = vadd.xlane.f32.xlu0 %v3147_v16 }
 0x639   :  { %v3149_v9 = vpop.xlane.xlu0 %3148 }
 0x63a   :  { %v3157_v61 = vadd.f32 %v3525_v17, %v3149_v9 }
 0x63c   :  { %3160 = vperm.xlu1 %3569, %v3157_v61  }
 0x63d   :  { %4162 = shalt.err (!%p4159_p0)
}
 0x63e   :  { %s4163_s18 = scalar_lea.hbm %s4554_s14, 256 }
 0x63f   :  { %p4164_p1 = scmp.ne.s32.totalorder %s4554_s14, %s4163_s18  ;;  %p4167_p2 = scmp.lt.u32.totalorder %s4163_s18, %s4554_s14 }
 0x641   :  { %p4169_p3 = pnand %p4167_p2, %p4164_p1 }
 0x643   :  { %4172 = shalt.err (!%p4169_p3)
}
 0x644   :  { %3176 = dma.vmem_to_hbm [thread:$0]  %s3174_s11, 256, %s4554_s14, [#allocation5]  }
 0x6bb   :  { %v3161_v5 = vpop.permute.xlu1 %3160 }
 0x6bc   :  { %v3163_v8 = vpack.c.bf16 %v3161_v5, %v3161_v5 }
 0x6be   :  { %3164 = vst [vmem:[%s4553_s13] sm:$0xf] %v3163_v8 }
 0x6bf   :  { %4177 = dma.done.wait [#allocation5], 256  }
 0x6c0   :  { %4178 = vsyncadd [#allocation5], 4294967040 }
 0x6c1   :  { %3182 = vsyncpa [#allocation4], 1 }
 0x6c2   :  { %3183 = vsyncpa [#allocation7], 1 }
 0x6c3   :  { %3184 = vsyncpa [#allocation5], 1 }

</bundles_post_ra>
